<compile_context>
chip_gen: v5e
topology: v5e:2x2
jax: 0.10.0
libtpu: 0.0.40
codegen_flags: <defaults>
</compile_context>

<pallas_src>
import math

import jax
import jax.numpy as jnp
from jax.experimental import pallas as pl
from jax.experimental.pallas import tpu as pltpu

TAU = 0.1                 # temperature of the synthetic contrastive loss
_EPS = 1e-12
_NEG = -1e30              # "minus infinity" for masked similarities (ref only)
_TYPE_SENTINEL = 1 << 20  # real labels_type ids assumed < 2**20


# ----------------------------------------------------------------------------
# Pallas kernel: one (query-tile, key-tile) step of the tiled pairwise loss.
# Embeddings arrive pre-normalized; the query side is pre-scaled by 1/TAU, so
# the dot directly yields cos-sim / TAU (bounded by +-1/TAU -> no running max).
# ----------------------------------------------------------------------------
def _supcon_kernel(eq_ref, ek_ref, ridq_ref, tkq_ref, lkq_ref,
                   ridk_ref, tkk_ref, lkk_ref,
                   sum_ref, cnt_ref, d_scr, n_scr):
    k = pl.program_id(1)
    nk = pl.num_programs(1)

    @pl.when(k == 0)
    def _init():
        d_scr[...] = jnp.zeros_like(d_scr)
        n_scr[...] = jnp.zeros_like(n_scr)

    # [TQ, TK] logits straight off the MXU (bf16 in, f32 accumulate).
    s = jax.lax.dot_general(eq_ref[...], ek_ref[...],
                            (((1,), (1,)), ((), ())),
                            preferred_element_type=jnp.float32)

    # valid pair: same packed (type, mark) key and not the self pair
    # (global row ids are precomputed inputs -> one compare, no iotas).
    valid = (tkq_ref[...] == tkk_ref[...]) & (ridq_ref[...] != ridk_ref[...])
    pos_f = (lkq_ref[...] == lkk_ref[...]).astype(jnp.float32)

    # Fixed-shift softmax terms; exp(|s|<=~10) is safe in f32.
    p = jnp.where(valid, jnp.exp(s), 0.0)                        # [TQ, TK]
    d_scr[...] += jnp.sum(p, axis=-1, keepdims=True)             # denom
    n_scr[...] += jnp.sum(p * pos_f, axis=-1, keepdims=True)     # numer

    @pl.when(k == nk - 1)
    def _finalize():
        d = d_scr[...]
        n = n_scr[...]
        has_pos = n > 0.0
        per_anchor = jnp.where(
            has_pos,
            jnp.log(jnp.maximum(d, 1e-30)) - jnp.log(jnp.maximum(n, 1e-30)),
            0.0)                                                  # [TQ, 1]
        sum_ref[0] = jnp.sum(per_anchor, axis=0, keepdims=True)   # (1, 1)
        cnt_ref[0] = jnp.sum(has_pos.astype(jnp.float32), axis=0,
                             keepdims=True)


# ----------------------------------------------------------------------------
# Tiling / VMEM configuration helpers.
# ----------------------------------------------------------------------------
def _round_up(x, m):
    return ((x + m - 1) // m) * m


def _pow2_floor(x):
    return 1 << (max(int(x), 1).bit_length() - 1)


def _pow2_ceil(x):
    x = max(int(x), 1)
    p = 1 << (x - 1).bit_length()
    return p


def _default_config():
    """Generation-aware defaults (tq, tk, vmem_limit_bytes)."""
    vmem_bytes = 64 * 1024 * 1024
    try:
        info = pltpu.get_tpu_info()
        vmem_bytes = int(getattr(info, "vmem_capacity_bytes", vmem_bytes))
    except Exception:
        pass
    if vmem_bytes >= 100 * 1024 * 1024:
        # v5e / v6e: 128 MiB physical VMEM -> big tiles, ~16 MiB of [TQ,TK]
        # f32 temporaries, raise the scoped limit well above the default.
        return 512, 2048, 64 * 1024 * 1024
    # v7x: 64 MiB physical VMEM -> cap the tile product and scoped limit.
    return 256, 2048, 48 * 1024 * 1024


def _choose_tiles(n, tq, tk):
    """Clamp (tq, tk) to powers of two that divide the padded batch and keep
    nq >= 2 where possible (so the 'parallel' query axis feeds both v7x TCs)."""
    tq = _pow2_floor(tq)
    tk = _pow2_floor(tk)
    tk = max(128, min(tk, _pow2_ceil(_round_up(n, 128))))
    tq_cap = max(8, _pow2_ceil(_round_up(n, 8)) // 2) if n >= 16 else 8
    tq = max(8, min(tq, tq_cap))
    n_pad = _round_up(n, max(tq, tk))
    return tq, tk, n_pad


# ----------------------------------------------------------------------------
# Wrapper: loss over the already-gathered batch (hot path in Pallas).
# ----------------------------------------------------------------------------
def supcon_loss(all_emb, all_labels, all_labels_type, all_labels_mark,
                *, tq=None, tk=None, vmem_limit_bytes=None):
    n, d = all_emb.shape

    tq_def, tk_def, vmem_def = _default_config()
    tq = tq_def if tq is None else tq
    tk = tk_def if tk is None else tk
    vmem_limit_bytes = vmem_def if vmem_limit_bytes is None else vmem_limit_bytes
    tq, tk, n_pad = _choose_tiles(n, tq, tk)
    pad = n_pad - n

    # ---- one-time prolog (outside the O(N^2) grid) -------------------------
    # L2-normalize in f32; fold 1/TAU into the query side; store bf16 for the
    # MXU (half the DMA + bf16 systolic array).  The kernel then never touches
    # norms or the temperature again.
    mxu_dtype = all_emb.dtype if all_emb.dtype == jnp.bfloat16 else jnp.bfloat16
    e = all_emb.astype(jnp.float32)
    en = e * jax.lax.rsqrt(jnp.sum(e * e, axis=-1, keepdims=True) + _EPS)
    emb_k = en.astype(mxu_dtype)
    emb_q = (en * (1.0 / TAU)).astype(mxu_dtype)

    labels = all_labels.astype(jnp.int32)
    types = all_labels_type.astype(jnp.int32)
    marks = all_labels_mark.astype(jnp.int32)
    if pad:
        emb_q = jnp.pad(emb_q, ((0, pad), (0, 0)))
        emb_k = jnp.pad(emb_k, ((0, pad), (0, 0)))
        labels = jnp.pad(labels, (0, pad))
        types = jnp.pad(types, (0, pad))
        marks = jnp.pad(marks, (0, pad))       # pad rows are unmarked -> inert

    # Pack (type, mark): unmarked rows (and padding) get a unique sentinel type
    # so they never form a valid pair with anyone; the self pair is excluded in
    # the kernel with a single row-id compare.  Assumes type ids < 2**20 and
    # n_pad << 2**31 - 2**20.
    idx = jnp.arange(n_pad, dtype=jnp.int32)
    tkey = jnp.where(marks > 0, types, _TYPE_SENTINEL + idx)
    lkey = labels

    ridq_col = idx.reshape(n_pad, 1)
    tkey_col = tkey.reshape(n_pad, 1)
    lkey_col = lkey.reshape(n_pad, 1)
    ridk_row = idx.reshape(1, n_pad)
    tkey_row = tkey.reshape(1, n_pad)
    lkey_row = lkey.reshape(1, n_pad)

    nq = n_pad // tq
    nk = n_pad // tk

    grid_spec = pltpu.PrefetchScalarGridSpec(
        num_scalar_prefetch=0,
        grid=(nq, nk),
        in_specs=[
            pl.BlockSpec((tq, d), lambda i, j: (i, 0)),   # query emb tile (pre-scaled)
            pl.BlockSpec((tk, d), lambda i, j: (j, 0)),   # key emb tile
            pl.BlockSpec((tq, 1), lambda i, j: (i, 0)),   # global row-id column
            pl.BlockSpec((tq, 1), lambda i, j: (i, 0)),   # tkey column
            pl.BlockSpec((tq, 1), lambda i, j: (i, 0)),   # lkey column
            pl.BlockSpec((1, tk), lambda i, j: (0, j)),   # global row-id row
            pl.BlockSpec((1, tk), lambda i, j: (0, j)),   # tkey row (lane-dense)
            pl.BlockSpec((1, tk), lambda i, j: (0, j)),   # lkey row (lane-dense)
        ],
        out_specs=(
            pl.BlockSpec((1, 1, 1), lambda i, j: (i, 0, 0)),  # per-q-tile sum
            pl.BlockSpec((1, 1, 1), lambda i, j: (i, 0, 0)),  # per-q-tile count
        ),
        scratch_shapes=[
            pltpu.VMEM((tq, 1), jnp.float32),   # running denom
            pltpu.VMEM((tq, 1), jnp.float32),   # running numer
        ],
    )

    psum, pcnt = pl.pallas_call(
        _supcon_kernel,
        out_shape=(jax.ShapeDtypeStruct((nq, 1, 1), jnp.float32),
                   jax.ShapeDtypeStruct((nq, 1, 1), jnp.float32)),
        grid_spec=grid_spec,
        compiler_params=pltpu.CompilerParams(
            dimension_semantics=("parallel", "arbitrary"),
            vmem_limit_bytes=vmem_limit_bytes),
    )(emb_q, emb_k, ridq_col, tkey_col, lkey_col, ridk_row, tkey_row, lkey_row)

    total = jnp.sum(psum)
    count = jnp.sum(pcnt)
    return total / jnp.maximum(count, 1.0)


# ----------------------------------------------------------------------------
# Mirror of DistributedLossWrapperWithTypeMark.forward.
# ----------------------------------------------------------------------------
def distributed_loss_wrapper_with_type_mark(per_rank_embeddings,
                                            per_rank_labels,
                                            per_rank_labels_type,
                                            per_rank_labels_mark,
                                            dim=0, **loss_kwargs):
    """GatherLayer.apply(embeddings) / all_gather(labels*) + torch.cat(dim)
    simulated by concatenating per-rank shards, then the wrapped loss.
    # TODO(synk): real multi-chip gather = ring all-gather via
    # pltpu.make_async_remote_copy + barrier semaphores, interleaved one remote
    # shard per key-tile step so RDMA overlaps the loss compute.
    """
    all_embeddings = jnp.concatenate(per_rank_embeddings, axis=dim)
    all_labels = jnp.concatenate(per_rank_labels, axis=dim)
    all_labels_type = jnp.concatenate(per_rank_labels_type, axis=dim)
    all_labels_mark = jnp.concatenate(per_rank_labels_mark, axis=dim)
    return supcon_loss(all_embeddings, all_labels,
                       all_labels_type, all_labels_mark, **loss_kwargs)


# ----------------------------------------------------------------------------
# Pure-JAX f32 reference (for correctness checking only).
# ----------------------------------------------------------------------------
def _reference_loss(emb, labels, types, marks):
    e = emb.astype(jnp.float32)
    en = e * jax.lax.rsqrt(jnp.sum(e * e, axis=-1, keepdims=True) + _EPS)
    s = (en @ en.T) / TAU
    n = e.shape[0]
    i = jnp.arange(n)
    not_diag = i[:, None] != i[None, :]
    valid = (not_diag
             & (types[:, None] == types[None, :])
             & (marks[:, None] > 0) & (marks[None, :] > 0))
    pos = valid & (labels[:, None] == labels[None, :])
    m = jnp.max(jnp.where(valid, s, _NEG), axis=-1, keepdims=True)
    ex = jnp.where(valid, jnp.exp(s - m), 0.0)
    denom = ex.sum(-1)
    numer = jnp.where(pos, ex, 0.0).sum(-1)
    has = numer > 0.0
    per = jnp.where(has,
                    jnp.log(jnp.maximum(denom, 1e-30))
                    - jnp.log(jnp.maximum(numer, 1e-30)), 0.0)
    return per.sum() / jnp.maximum(has.sum().astype(jnp.float32), 1.0)


if __name__ == "__main__":
    WORLD_SIZE = 2     # simulated ranks
    N_PER_RANK = 128   # per-rank batch
    D = 64             # embedding dim

    key = jax.random.PRNGKey(0)
    emb_shards, lab_shards, typ_shards, mrk_shards = [], [], [], []
    for _ in range(WORLD_SIZE):
        key, k_e, k_l, k_t, k_m = jax.random.split(key, 5)
        emb_shards.append(jax.random.normal(
            k_e, (N_PER_RANK, D), dtype=jnp.float32).astype(jnp.bfloat16))
        lab_shards.append(jax.random.randint(
            k_l, (N_PER_RANK,), 0, 4, dtype=jnp.int32))
        typ_shards.append(jax.random.randint(
            k_t, (N_PER_RANK,), 0, 2, dtype=jnp.int32))
        mrk_shards.append(
            jax.random.bernoulli(k_m, 0.8, (N_PER_RANK,)).astype(jnp.int32))

    # Small tiles so the demo exercises the (nq, nk) grid and the cross-key-tile
    # denom/numer accumulation; production defaults are generation-aware
    # (tq=512/tk=2048 on v5e/v6e, tq=256/tk=2048 on v7x).
    loss = distributed_loss_wrapper_with_type_mark(
        emb_shards, lab_shards, typ_shards, mrk_shards, dim=0, tq=128, tk=128)
    loss = jax.block_until_ready(loss)

    # Reference on the gathered batch (loose tolerance: bf16 MXU vs f32 ref).
    all_emb = jnp.concatenate(emb_shards, axis=0)
    all_lab = jnp.concatenate(lab_shards, axis=0)
    all_typ = jnp.concatenate(typ_shards, axis=0)
    all_mrk = jnp.concatenate(mrk_shards, axis=0)
    ref = jax.block_until_ready(_reference_loss(all_emb, all_lab, all_typ, all_mrk))

    assert jnp.isfinite(loss), "loss is not finite"
    assert abs(float(loss) - float(ref)) <= 0.15 + 0.05 * abs(float(ref)), \
        f"kernel loss {float(loss)} vs reference {float(ref)}"
    print("KERNEL_OK")
</pallas_src>

<mosaic_0001>
module attributes {stable_mosaic.version = 11 : i64} {
  func.func @_supcon_kernel(%arg0: i32, %arg1: i32, %arg2: memref<128x64xbf16, #tpu.memory_space<vmem>>, %arg3: memref<128x64xbf16, #tpu.memory_space<vmem>>, %arg4: memref<128x1xi32, #tpu.memory_space<vmem>>, %arg5: memref<128x1xi32, #tpu.memory_space<vmem>>, %arg6: memref<128x1xi32, #tpu.memory_space<vmem>>, %arg7: memref<1x128xi32, #tpu.memory_space<vmem>>, %arg8: memref<1x128xi32, #tpu.memory_space<vmem>>, %arg9: memref<1x128xi32, #tpu.memory_space<vmem>>, %arg10: memref<1x1x1xf32, #tpu.memory_space<vmem>>, %arg11: memref<1x1x1xf32, #tpu.memory_space<vmem>>, %arg12: memref<128x1xf32, #tpu.memory_space<vmem>>, %arg13: memref<128x1xf32, #tpu.memory_space<vmem>>) attributes {dimension_semantics = [#tpu.dimension_semantics<parallel>, #tpu.dimension_semantics<arbitrary>], iteration_bounds = array<i64: 2, 2>, scalar_prefetch = 0 : i64, scratch_operands = 2 : i64, tpu.core_type = #tpu.core_type<tc>, window_params = [{transform_indices = @transform_0, window_bounds = array<i64: 128, 64>}, {transform_indices = @transform_1, window_bounds = array<i64: 128, 64>}, {transform_indices = @transform_2, window_bounds = array<i64: 128, 1>}, {transform_indices = @transform_3, window_bounds = array<i64: 128, 1>}, {transform_indices = @transform_4, window_bounds = array<i64: 128, 1>}, {transform_indices = @transform_5, window_bounds = array<i64: 1, 128>}, {transform_indices = @transform_6, window_bounds = array<i64: 1, 128>}, {transform_indices = @transform_7, window_bounds = array<i64: 1, 128>}, {transform_indices = @transform_8, window_bounds = array<i64: 1, 1, 1>}, {transform_indices = @transform_9, window_bounds = array<i64: 1, 1, 1>}]} {
    %c0_i32 = arith.constant 0 : i32
    %0 = arith.cmpi eq, %arg1, %c0_i32 : i32
    %1 = arith.extui %0 : i1 to i32
    %c0_i32_0 = arith.constant 0 : i32
    %2 = arith.cmpi ne, %1, %c0_i32_0 : i32
    scf.if %2 {
      %cst_28 = arith.constant 0.000000e+00 : f32
      %41 = vector.broadcast %cst_28 : f32 to vector<128x1xf32>
      %c0_29 = arith.constant 0 : index
      %c0_30 = arith.constant 0 : index
      %42 = vector.load %arg12[%c0_29, %c0_30] : memref<128x1xf32, #tpu.memory_space<vmem>>, vector<128x1xf32>
      tpu.vector_store %arg12[%c0_29, %c0_30], %41 {strides = array<i32>} : memref<128x1xf32, #tpu.memory_space<vmem>>, vector<128x1xf32>,
      %cst_31 = arith.constant 0.000000e+00 : f32
      %43 = vector.broadcast %cst_31 : f32 to vector<128x1xf32>
      %c0_32 = arith.constant 0 : index
      %c0_33 = arith.constant 0 : index
      %44 = vector.load %arg13[%c0_32, %c0_33] : memref<128x1xf32, #tpu.memory_space<vmem>>, vector<128x1xf32>
      tpu.vector_store %arg13[%c0_32, %c0_33], %43 {strides = array<i32>} : memref<128x1xf32, #tpu.memory_space<vmem>>, vector<128x1xf32>,
    } else {
    }
    %c0 = arith.constant 0 : index
    %c0_1 = arith.constant 0 : index
    %3 = vector.load %arg2[%c0, %c0_1] : memref<128x64xbf16, #tpu.memory_space<vmem>>, vector<128x64xbf16>
    %c0_2 = arith.constant 0 : index
    %c0_3 = arith.constant 0 : index
    %4 = vector.load %arg3[%c0_2, %c0_3] : memref<128x64xbf16, #tpu.memory_space<vmem>>, vector<128x64xbf16>
    %cst = arith.constant dense<0.000000e+00> : vector<128x128xf32>
    %5 = tpu.matmul %3, %4, %cst {dimension_numbers = #tpu.dot_dimension_numbers<[1], [1], [0], [0], [0, 0, 1, 0], [], []>} : vector<128x64xbf16>, vector<128x64xbf16>, vector<128x128xf32> -> vector<128x128xf32>
    %c0_4 = arith.constant 0 : index
    %c0_5 = arith.constant 0 : index
    %6 = vector.load %arg5[%c0_4, %c0_5] : memref<128x1xi32, #tpu.memory_space<vmem>>, vector<128x1xi32>
    %c0_6 = arith.constant 0 : index
    %c0_7 = arith.constant 0 : index
    %7 = vector.load %arg8[%c0_6, %c0_7] : memref<1x128xi32, #tpu.memory_space<vmem>>, vector<1x128xi32>
    %8 = vector.broadcast %6 : vector<128x1xi32> to vector<128x128xi32>
    %9 = vector.broadcast %7 : vector<1x128xi32> to vector<128x128xi32>
    %10 = arith.cmpi eq, %8, %9 : vector<128x128xi32>
    %c0_8 = arith.constant 0 : index
    %c0_9 = arith.constant 0 : index
    %11 = vector.load %arg4[%c0_8, %c0_9] : memref<128x1xi32, #tpu.memory_space<vmem>>, vector<128x1xi32>
    %c0_10 = arith.constant 0 : index
    %c0_11 = arith.constant 0 : index
    %12 = vector.load %arg7[%c0_10, %c0_11] : memref<1x128xi32, #tpu.memory_space<vmem>>, vector<1x128xi32>
    %13 = vector.broadcast %11 : vector<128x1xi32> to vector<128x128xi32>
    %14 = vector.broadcast %12 : vector<1x128xi32> to vector<128x128xi32>
    %15 = arith.cmpi ne, %13, %14 : vector<128x128xi32>
    %16 = arith.andi %10, %15 : vector<128x128xi1>
    %c0_12 = arith.constant 0 : index
    %c0_13 = arith.constant 0 : index
    %17 = vector.load %arg6[%c0_12, %c0_13] : memref<128x1xi32, #tpu.memory_space<vmem>>, vector<128x1xi32>
    %c0_14 = arith.constant 0 : index
    %c0_15 = arith.constant 0 : index
    %18 = vector.load %arg9[%c0_14, %c0_15] : memref<1x128xi32, #tpu.memory_space<vmem>>, vector<1x128xi32>
    %19 = vector.broadcast %17 : vector<128x1xi32> to vector<128x128xi32>
    %20 = vector.broadcast %18 : vector<1x128xi32> to vector<128x128xi32>
    %21 = arith.cmpi eq, %19, %20 : vector<128x128xi32>
    %22 = arith.extui %21 : vector<128x128xi1> to vector<128x128xi32>
    %23 = arith.sitofp %22 : vector<128x128xi32> to vector<128x128xf32>
    %24 = math.exp %5 : vector<128x128xf32>
    %cst_16 = arith.constant 0.000000e+00 : f32
    %25 = vector.broadcast %cst_16 : f32 to vector<128x128xf32>
    %26 = arith.select %16, %24, %25 : vector<128x128xi1>, vector<128x128xf32>
    %c0_17 = arith.constant 0 : index
    %c0_18 = arith.constant 0 : index
    %27 = vector.load %arg12[%c0_17, %c0_18] : memref<128x1xf32, #tpu.memory_space<vmem>>, vector<128x1xf32>
    %cst_19 = arith.constant dense<0.000000e+00> : vector<128xf32>
    %28 = vector.multi_reduction <add>, %26, %cst_19 [1] : vector<128x128xf32> to vector<128xf32>
    %29 = vector.shape_cast %28 : vector<128xf32> to vector<128x1xf32>
    %30 = arith.addf %27, %29 : vector<128x1xf32>
    %c0_20 = arith.constant 0 : index
    %c0_21 = arith.constant 0 : index
    %31 = vector.load %arg12[%c0_20, %c0_21] : memref<128x1xf32, #tpu.memory_space<vmem>>, vector<128x1xf32>
    tpu.vector_store %arg12[%c0_20, %c0_21], %30 {strides = array<i32>} : memref<128x1xf32, #tpu.memory_space<vmem>>, vector<128x1xf32>,
    %c0_22 = arith.constant 0 : index
    %c0_23 = arith.constant 0 : index
    %32 = vector.load %arg13[%c0_22, %c0_23] : memref<128x1xf32, #tpu.memory_space<vmem>>, vector<128x1xf32>
    %33 = arith.mulf %26, %23 : vector<128x128xf32>
    %cst_24 = arith.constant dense<0.000000e+00> : vector<128xf32>
    %34 = vector.multi_reduction <add>, %33, %cst_24 [1] : vector<128x128xf32> to vector<128xf32>
    %35 = vector.shape_cast %34 : vector<128xf32> to vector<128x1xf32>
    %36 = arith.addf %32, %35 : vector<128x1xf32>
    %c0_25 = arith.constant 0 : index
    %c0_26 = arith.constant 0 : index
    %37 = vector.load %arg13[%c0_25, %c0_26] : memref<128x1xf32, #tpu.memory_space<vmem>>, vector<128x1xf32>
    tpu.vector_store %arg13[%c0_25, %c0_26], %36 {strides = array<i32>} : memref<128x1xf32, #tpu.memory_space<vmem>>, vector<128x1xf32>,
    %c1_i32 = arith.constant 1 : i32
    %38 = arith.cmpi eq, %arg1, %c1_i32 : i32
    %39 = arith.extui %38 : i1 to i32
    %c0_i32_27 = arith.constant 0 : i32
    %40 = arith.cmpi ne, %39, %c0_i32_27 : i32
    scf.if %40 {
      %c0_28 = arith.constant 0 : index
      %c0_29 = arith.constant 0 : index
      %41 = vector.load %arg12[%c0_28, %c0_29] : memref<128x1xf32, #tpu.memory_space<vmem>>, vector<128x1xf32>
      %c0_30 = arith.constant 0 : index
      %c0_31 = arith.constant 0 : index
      %42 = vector.load %arg13[%c0_30, %c0_31] : memref<128x1xf32, #tpu.memory_space<vmem>>, vector<128x1xf32>
      %cst_32 = arith.constant 0.000000e+00 : f32
      %43 = vector.broadcast %cst_32 : f32 to vector<128x1xf32>
      %44 = arith.cmpf ogt, %42, %43 : vector<128x1xf32>
      %cst_33 = arith.constant 1.000000e-30 : f32
      %45 = vector.broadcast %cst_33 : f32 to vector<128x1xf32>
      %46 = arith.maximumf %41, %45 : vector<128x1xf32>
      %47 = math.log %46 : vector<128x1xf32>
      %cst_34 = arith.constant 1.000000e-30 : f32
      %48 = vector.broadcast %cst_34 : f32 to vector<128x1xf32>
      %49 = arith.maximumf %42, %48 : vector<128x1xf32>
      %50 = math.log %49 : vector<128x1xf32>
      %51 = arith.subf %47, %50 : vector<128x1xf32>
      %cst_35 = arith.constant 0.000000e+00 : f32
      %52 = vector.broadcast %cst_35 : f32 to vector<128x1xf32>
      %53 = arith.select %44, %51, %52 : vector<128x1xi1>, vector<128x1xf32>
      %cst_36 = arith.constant dense<0.000000e+00> : vector<1xf32>
      %54 = vector.multi_reduction <add>, %53, %cst_36 [0] : vector<128x1xf32> to vector<1xf32>
      %55 = vector.shape_cast %54 : vector<1xf32> to vector<1x1xf32>
      %c0_37 = arith.constant 0 : index
      %c0_38 = arith.constant 0 : index
      %c0_39 = arith.constant 0 : index
      %56 = vector.load %arg10[%c0_37, %c0_38, %c0_39] : memref<1x1x1xf32, #tpu.memory_space<vmem>>, vector<1x1x1xf32>
      %57 = vector.shape_cast %56 : vector<1x1x1xf32> to vector<1x1xf32>
      %58 = vector.shape_cast %55 : vector<1x1xf32> to vector<1x1x1xf32>
      tpu.vector_store %arg10[%c0_37, %c0_38, %c0_39], %58 {strides = array<i32>} : memref<1x1x1xf32, #tpu.memory_space<vmem>>, vector<1x1x1xf32>,
      %59 = arith.extui %44 : vector<128x1xi1> to vector<128x1xi32>
      %60 = arith.sitofp %59 : vector<128x1xi32> to vector<128x1xf32>
      %cst_40 = arith.constant dense<0.000000e+00> : vector<1xf32>
      %61 = vector.multi_reduction <add>, %60, %cst_40 [0] : vector<128x1xf32> to vector<1xf32>
      %62 = vector.shape_cast %61 : vector<1xf32> to vector<1x1xf32>
      %c0_41 = arith.constant 0 : index
      %c0_42 = arith.constant 0 : index
      %c0_43 = arith.constant 0 : index
      %63 = vector.load %arg11[%c0_41, %c0_42, %c0_43] : memref<1x1x1xf32, #tpu.memory_space<vmem>>, vector<1x1x1xf32>
      %64 = vector.shape_cast %63 : vector<1x1x1xf32> to vector<1x1xf32>
      %65 = vector.shape_cast %62 : vector<1x1xf32> to vector<1x1x1xf32>
      tpu.vector_store %arg11[%c0_41, %c0_42, %c0_43], %65 {strides = array<i32>} : memref<1x1x1xf32, #tpu.memory_space<vmem>>, vector<1x1x1xf32>,
    } else {
    }
    return
  }
  func.func @transform_0(%arg0: i32, %arg1: i32) -> (i32, i32) {
    %c0_i32 = arith.constant 0 : i32
    %c0_i32_0 = arith.constant 0 : i32
    return %arg0, %c0_i32 : i32, i32
  }
  func.func @transform_1(%arg0: i32, %arg1: i32) -> (i32, i32) {
    %c0_i32 = arith.constant 0 : i32
    %c0_i32_0 = arith.constant 0 : i32
    return %arg1, %c0_i32 : i32, i32
  }
  func.func @transform_2(%arg0: i32, %arg1: i32) -> (i32, i32) {
    %c0_i32 = arith.constant 0 : i32
    %c0_i32_0 = arith.constant 0 : i32
    return %arg0, %c0_i32 : i32, i32
  }
  func.func @transform_3(%arg0: i32, %arg1: i32) -> (i32, i32) {
    %c0_i32 = arith.constant 0 : i32
    %c0_i32_0 = arith.constant 0 : i32
    return %arg0, %c0_i32 : i32, i32
  }
  func.func @transform_4(%arg0: i32, %arg1: i32) -> (i32, i32) {
    %c0_i32 = arith.constant 0 : i32
    %c0_i32_0 = arith.constant 0 : i32
    return %arg0, %c0_i32 : i32, i32
  }
  func.func @transform_5(%arg0: i32, %arg1: i32) -> (i32, i32) {
    %c0_i32 = arith.constant 0 : i32
    %c0_i32_0 = arith.constant 0 : i32
    return %c0_i32, %arg1 : i32, i32
  }
  func.func @transform_6(%arg0: i32, %arg1: i32) -> (i32, i32) {
    %c0_i32 = arith.constant 0 : i32
    %c0_i32_0 = arith.constant 0 : i32
    return %c0_i32, %arg1 : i32, i32
  }
  func.func @transform_7(%arg0: i32, %arg1: i32) -> (i32, i32) {
    %c0_i32 = arith.constant 0 : i32
    %c0_i32_0 = arith.constant 0 : i32
    return %c0_i32, %arg1 : i32, i32
  }
  func.func @transform_8(%arg0: i32, %arg1: i32) -> (i32, i32, i32) {
    %c0_i32 = arith.constant 0 : i32
    %c0_i32_0 = arith.constant 0 : i32
    %c0_i32_1 = arith.constant 0 : i32
    return %arg0, %c0_i32, %c0_i32_0 : i32, i32, i32
  }
  func.func @transform_9(%arg0: i32, %arg1: i32) -> (i32, i32, i32) {
    %c0_i32 = arith.constant 0 : i32
    %c0_i32_0 = arith.constant 0 : i32
    %c0_i32_1 = arith.constant 0 : i32
    return %arg0, %c0_i32, %c0_i32_0 : i32, i32, i32
  }
}

</mosaic_0001>

<bundles_post_ra>
// kernel: tpu_custom_call.1
= control target key start
LH: loop header
LB: loop body
LE: loop exit
PB: predicated region body
PF: predicated region fallthrough
CT: control target
= control target key end

     0   :  { %s2098_s30 = smov 0   ;;  %s2100_s10 = smov 0   ;;  %s2788_s0 = inlined_call_operand.vmem [shape: bf16[256,64], index: 0, kind: input, shape index: {}]   ;;  %s2789_s1 = inlined_call_operand.vmem [shape: bf16[256,64], index: 1, kind: input, shape index: {}]   ;;  %s2790_s2 = inlined_call_operand.vmem [shape: s32[256,1], index: 2, kind: input, shape index: {}]   ;;  %s2791_s3 = inlined_call_operand.vmem [shape: s32[256,1], index: 3, kind: input, shape index: {}]   ;;  %s2792_s4 = inlined_call_operand.vmem [shape: s32[256,1], index: 4, kind: input, shape index: {}]   ;;  %s2793_s5 = inlined_call_operand.vmem [shape: s32[1,256], index: 5, kind: input, shape index: {}]   ;;  %s2794_s6 = inlined_call_operand.vmem [shape: s32[1,256], index: 6, kind: input, shape index: {}]   ;;  %s2795_s7 = inlined_call_operand.vmem [shape: s32[1,256], index: 7, kind: input, shape index: {}]   ;;  %s2796_s8 = inlined_call_operand.vmem [shape: f32[2,1,1], index: 8, kind: output, shape index: {0}]   ;;  %s2797_s9 = inlined_call_operand.vmem [shape: f32[2,1,1], index: 9, kind: output, shape index: {1}]  }
   0x1   :  { %2799 = sst [smem:[#allocation7_spill]] %s2788_s0  ;;  %s2102_s11 = smov 0  }
   0x2   :  { %2800 = sst [smem:[#allocation8_spill]] %s2789_s1  ;;  %s2104_s12 = smov 0  }
   0x3   :  { %2801 = sst [smem:[#allocation9_spill]] %s2790_s2  ;;  %s2106_s13 = smov 0  }
   0x4   :  { %2802 = sst [smem:[#allocation10_spill]] %s2791_s3 }
   0x5 LB: > { %2803 = sst [smem:[#allocation4_spill]] %s2038_s12  ;;  %s29_s14 = sadd.s32 1, %s2034_s11  ;;  %s2042_s13 = sphi %s2106_s13, %s20_s13   ;;  %s2038_s12 = sphi %s2104_s12, %s2825_s12   ;;  %s2034_s11 = sphi %s2102_s11, %s2827_s11   ;;  %s2030_s10 = sphi %s2100_s10, %s2823_s10   ;;  %s2026_s30 = sphi %s2098_s30, %s2826_s30  }
   0x6   : > { %s32_s15 = sadd.s32 1, %s2038_s12  ;;  %p30_p0 = scmp.ge.s32.totalorder %s29_s14, 2 }
   0x7   : > { %p1699_p1 = scmp.ge.s32.totalorder %s2042_s13, 1  ;;  %p371_p2 = scmp.lt.s32.totalorder %s2042_s13, 5 }
   0x8   : > { %s2829_s14 = smov (%p30_p0, %s29_s14), 0  ;;  %s2831_s15 = smov (!%p30_p0, %s32_s15), %s2038_s12 }
   0x9   : > { %2804 = sst [smem:[#allocation5_spill]] %s2829_s14  ;;  %p372_p3 = pnand %p1699_p1, %p371_p2 }
   0xa   : > { %p34_p4 = scmp.ge.s32.totalorder %s2831_s15, 2  ;;  %s1700_s16 = sshll.u32 (!%p372_p3), %s2030_s10, 4 }
   0xb   : > { %375 = sbr.rel (%p372_p3) target bundleno = 561 (0x231), region = 52  ;;  %s1702_s17 = sshll.u32 (!%p372_p3), %s2026_s30, 4 }
   0xc   : > { %s2833_s15 = smov (%p34_p4, %s2831_s15), 0  ;;  %p438_p5 = scmp.lt.s32.totalorder (!%p372_p3), %s1700_s16, 31 }
   0xd   : > { %2805 = sst [smem:[#allocation6_spill]] %s2833_s15  ;;  %p444_p6 = scmp.lt.s32.totalorder (!%p372_p3), %s1702_s17, 31 }
   0xe   : > { %p467_p7 = scmp.lt.s32.totalorder (!%p372_p3), %s2026_s30, 1  ;;  %p476_p8 = scmp.lt.s32.totalorder (!%p372_p3), %s2030_s10, 1 }
   0xf   : > { %s2806_s0 = sld [smem:[#allocation7_spill]] (!%p372_p3)  ;;  %p1710_p9 = scmp.ne.s32.totalorder (!%p372_p3), %s2026_s30, 0 }
  0x10   : > { %s2835_s16 = smov (!%p438_p5, %s1700_s16), 31  ;;  %s2837_s17 = smov (!%p444_p6, %s1702_s17), 31 }
  0x11   : > { %s1701_s18 = sshll.u32 %s2835_s16, 2  ;;  %s1705_s19 = sshll.u32 %s2835_s16, 3 }
  0x12   : > { %s1703_s23 = sshll.u32 %s2837_s17, 2  ;;  %s2807_s1 = sld [smem:[#allocation8_spill]] }
  0x13   : > { %s2808_s2 = sld [smem:[#allocation9_spill]]  ;;  %s2839_s10 = smov (!%p476_p8, %s2030_s10), 1 }
  0x14   : > { %s2809_s3 = sld [smem:[#allocation10_spill]] }
  0x15   : > { %s2139_s22 = scalar_lea.vmem %s2806_s0, %s1701_s18  ;;  %s2159_s18 = scalar_lea.vmem %s2792_s4, %s1705_s19 }
  0x16   : > { %s2162_s17 = scalar_select %p467_p7, %s2026_s30, 1 }
  0x17   : > { %s478_s0 = scalar_lea.vmem %s2796_s8, %s2839_s10  ;;  %485 = sbr.rel (%p1710_p9) target bundleno = 61 (0x3d), region = 56 }
  0x18   : > { %s2144_s26 = scalar_lea.vmem %s2807_s1, %s1703_s23  ;;  %s469_s14 = scalar_lea.vmem %s2793_s5, %s2162_s17 }
  0x19   : > { %s2149_s29 = scalar_lea.vmem %s2808_s2, %s1705_s19  ;;  %s472_s25 = scalar_lea.vmem %s2794_s6, %s2162_s17 }
  0x1a   : > { %s2154_s16 = scalar_lea.vmem %s2809_s3, %s1705_s19  ;;  %s475_s27 = scalar_lea.vmem %s2795_s7, %s2162_s17 }
  0x1b   : > { %s481_s3 = scalar_lea.vmem %s2797_s9, %s2839_s10 }
  0x1c   : > { %vm486_vm0 = vcmask 7168   ;;  %v2044_v0 = vmov 0.0  }
  0x1d   : > { %487 = vst.msk [vmem:[#allocation2] sm:$0xff] %vm486_vm0, %v2044_v0 }
  0x1e   : > { %488 = vst.msk [vmem:[#allocation2 + $0x8] sm:$0xff] %vm486_vm0, %v2044_v0 }
  0x1f   : > { %489 = vst.msk [vmem:[#allocation2 + $0x10] sm:$0xff] %vm486_vm0, %v2044_v0 }
  0x20   : > { %490 = vst.msk [vmem:[#allocation2 + $0x18] sm:$0xff] %vm486_vm0, %v2044_v0 }
  0x21   : > { %491 = vst.msk [vmem:[#allocation2 + $0x20] sm:$0xff] %vm486_vm0, %v2044_v0 }
  0x22   : > { %492 = vst.msk [vmem:[#allocation2 + $0x28] sm:$0xff] %vm486_vm0, %v2044_v0 }
  0x23   : > { %493 = vst.msk [vmem:[#allocation2 + $0x30] sm:$0xff] %vm486_vm0, %v2044_v0 }
  0x24   : > { %494 = vst.msk [vmem:[#allocation2 + $0x38] sm:$0xff] %vm486_vm0, %v2044_v0 }
  0x25   : > { %495 = vst.msk [vmem:[#allocation2 + $0x40] sm:$0xff] %vm486_vm0, %v2044_v0 }
  0x26   : > { %496 = vst.msk [vmem:[#allocation2 + $0x48] sm:$0xff] %vm486_vm0, %v2044_v0 }
  0x27   : > { %497 = vst.msk [vmem:[#allocation2 + $0x50] sm:$0xff] %vm486_vm0, %v2044_v0 }
  0x28   : > { %498 = vst.msk [vmem:[#allocation2 + $0x58] sm:$0xff] %vm486_vm0, %v2044_v0 }
  0x29   : > { %499 = vst.msk [vmem:[#allocation2 + $0x60] sm:$0xff] %vm486_vm0, %v2044_v0 }
  0x2a   : > { %500 = vst.msk [vmem:[#allocation2 + $0x68] sm:$0xff] %vm486_vm0, %v2044_v0 }
  0x2b   : > { %501 = vst.msk [vmem:[#allocation2 + $0x70] sm:$0xff] %vm486_vm0, %v2044_v0 }
  0x2c   : > { %502 = vst.msk [vmem:[#allocation2 + $0x78] sm:$0xff] %vm486_vm0, %v2044_v0 }
  0x2d   : > { %503 = vst.msk [vmem:[#allocation3] sm:$0xff] %vm486_vm0, %v2044_v0 }
  0x2e   : > { %504 = vst.msk [vmem:[#allocation3 + $0x8] sm:$0xff] %vm486_vm0, %v2044_v0 }
  0x2f   : > { %505 = vst.msk [vmem:[#allocation3 + $0x10] sm:$0xff] %vm486_vm0, %v2044_v0 }
  0x30   : > { %506 = vst.msk [vmem:[#allocation3 + $0x18] sm:$0xff] %vm486_vm0, %v2044_v0 }
  0x31   : > { %507 = vst.msk [vmem:[#allocation3 + $0x20] sm:$0xff] %vm486_vm0, %v2044_v0 }
  0x32   : > { %508 = vst.msk [vmem:[#allocation3 + $0x28] sm:$0xff] %vm486_vm0, %v2044_v0 }
  0x33   : > { %509 = vst.msk [vmem:[#allocation3 + $0x30] sm:$0xff] %vm486_vm0, %v2044_v0 }
  0x34   : > { %510 = vst.msk [vmem:[#allocation3 + $0x38] sm:$0xff] %vm486_vm0, %v2044_v0 }
  0x35   : > { %511 = vst.msk [vmem:[#allocation3 + $0x40] sm:$0xff] %vm486_vm0, %v2044_v0 }
  0x36   : > { %512 = vst.msk [vmem:[#allocation3 + $0x48] sm:$0xff] %vm486_vm0, %v2044_v0 }
  0x37   : > { %513 = vst.msk [vmem:[#allocation3 + $0x50] sm:$0xff] %vm486_vm0, %v2044_v0 }
  0x38   : > { %514 = vst.msk [vmem:[#allocation3 + $0x58] sm:$0xff] %vm486_vm0, %v2044_v0 }
  0x39   : > { %515 = vst.msk [vmem:[#allocation3 + $0x60] sm:$0xff] %vm486_vm0, %v2044_v0 }
  0x3a   : > { %516 = vst.msk [vmem:[#allocation3 + $0x68] sm:$0xff] %vm486_vm0, %v2044_v0 }
  0x3b   : > { %517 = vst.msk [vmem:[#allocation3 + $0x70] sm:$0xff] %vm486_vm0, %v2044_v0 }
  0x3c   : > { %518 = vst.msk [vmem:[#allocation3 + $0x78] sm:$0xff] %vm486_vm0, %v2044_v0 }
  0x3d PF: > { %v733_v1 = vld [vmem:[%s2154_s16 + $0x20] sm:$0xff]  ;;  %v731_v2 = vld [vmem:[%s2154_s16 + $0x10] sm:$0xff]  ;;  %vm631_vm1 = vcmask 523264   ;;  %v2045_v4 = vmov 0   ;;  %v1833_v5 = vld [vmem:[%s2144_s26 + $0x38] sm:$0xff]  ;;  %p1799_p10 = scmp.ne.s32.totalorder %s2026_s30, 1 }
  0x3e   : > { %v729_v3 = vld [vmem:[%s2154_s16] sm:$0xff]  ;;  %1904 = vset.pattern.permute.xlu2 %v2045_v4  ;;  %1903 = vset.pattern.permute.xlu1 %v2045_v4  ;;  %v678_v6 = vsel %vm631_vm1, %v1833_v5, 0  ;;  %v1832_v7 = vld [vmem:[%s2144_s26 + $0x30] sm:$0xff]  ;;  %v734_v8 = vld [vmem:[%s2154_s16 + $0x28] sm:$0xff] }
  0x3f   : > { %1902 = vset.pattern.permute.xlu0 %v2045_v4  ;;  %759 = vperm.xlu2 %1904, %v733_v1   ;;  %v732_v9 = vld [vmem:[%s2154_s16 + $0x18] sm:$0xff]  ;;  %v730_v10 = vld [vmem:[%s2154_s16 + $0x8] sm:$0xff]  ;;  %v675_v11 = vsel %vm631_vm1, %v1832_v7, 0  ;;  %v737_v13 = vld [vmem:[%s2154_s16 + $0x40] sm:$0xff] }
  0x40   : > { %753 = vperm.xlu1 %1903, %v731_v2   ;;  %747 = vperm.xlu0 %1902, %v729_v3   ;;  %v1831_v12 = vld [vmem:[%s2144_s26 + $0x28] sm:$0xff]  ;;  %v736_v14 = vld [vmem:[%s2154_s16 + $0x38] sm:$0xff]  ;;  %v735_v15 = vld [vmem:[%s2154_s16 + $0x30] sm:$0xff] }
  0x41   : > { %680 = vmatpush.bf16.xpose.msra.mxu0 %v678_v6  ;;  %1834 = vmatpush.bf16.xpose.msra.mxu1 %v678_v6  ;;  %v672_v16 = vsel %vm631_vm1, %v1831_v12, 0  ;;  %v1830_v17 = vld [vmem:[%s2144_s26 + $0x20] sm:$0xff]  ;;  %v740_v18 = vld [vmem:[%s2154_s16 + $0x58] sm:$0xff]  ;;  %v739_v19 = vld [vmem:[%s2154_s16 + $0x50] sm:$0xff] }
  0x42   : > { %1835 = vmatpush.bf16.xpose.msra.mxu2 %v678_v6  ;;  %1836 = vmatpush.bf16.xpose.msra.mxu3 %v678_v6  ;;  %v738_v20 = vld [vmem:[%s2154_s16 + $0x48] sm:$0xff]  ;;  %v669_v21 = vsel %vm631_vm1, %v1830_v17, 0  ;;  %v1829_v22 = vld [vmem:[%s2144_s26 + $0x18] sm:$0xff]  ;;  %v743_v23 = vld [vmem:[%s2154_s16 + $0x70] sm:$0xff] }
  0x43   : > { %v742_v24 = vld [vmem:[%s2154_s16 + $0x68] sm:$0xff]  ;;  %v741_v25 = vld [vmem:[%s2154_s16 + $0x60] sm:$0xff]  ;;  %v666_v26 = vsel %vm631_vm1, %v1829_v22, 0  ;;  %v1828_v27 = vld [vmem:[%s2144_s26 + $0x10] sm:$0xff] }
  0x44   : > { %v812_v28 = vld [vmem:[%s2149_s29 + $0x8] sm:$0xff]  ;;  %v811_v29 = vld [vmem:[%s2149_s29] sm:$0xff]  ;;  %v744_v30 = vld [vmem:[%s2154_s16 + $0x78] sm:$0xff]  ;;  %v663_v31 = vsel %vm631_vm1, %v1828_v27, 0 }
  0x45   : > { %v1827_v32 = vld [vmem:[%s2144_s26 + $0x8] sm:$0xff]  ;;  %v815_v33 = vld [vmem:[%s2149_s29 + $0x20] sm:$0xff]  ;;  %v814_v34 = vld [vmem:[%s2149_s29 + $0x18] sm:$0xff] }
  0x46   : > { %v813_v35 = vld [vmem:[%s2149_s29 + $0x10] sm:$0xff]  ;;  %v660_v36 = vsel %vm631_vm1, %v1827_v32, 0  ;;  %v1826_v37 = vld [vmem:[%s2144_s26] sm:$0xff]  ;;  %v818_v38 = vld [vmem:[%s2149_s29 + $0x38] sm:$0xff] }
  0x47   : > { %762 = vperm.xlu2 %1904, %v734_v8   ;;  %v817_v39 = vld [vmem:[%s2149_s29 + $0x30] sm:$0xff]  ;;  %v816_v40 = vld [vmem:[%s2149_s29 + $0x28] sm:$0xff]  ;;  %v657_v41 = vsel %vm631_vm1, %v1826_v37, 0  ;;  %v819_v44 = vld [vmem:[%s2149_s29 + $0x40] sm:$0xff] }
  0x48   : > { %756 = vperm.xlu1 %1903, %v732_v9   ;;  %750 = vperm.xlu0 %1902, %v730_v10   ;;  %v821_v42 = vld [vmem:[%s2149_s29 + $0x50] sm:$0xff]  ;;  %v820_v43 = vld [vmem:[%s2149_s29 + $0x48] sm:$0xff]  ;;  %v1818_v45 = vld [vmem:[%s2139_s22] sm:$0xff] }
  0x49   : > { %681 = vmatpush.bf16.xpose.msra.mxu0 %v675_v11  ;;  %1837 = vmatpush.bf16.xpose.msra.mxu1 %v675_v11  ;;  %v1820_v46 = vld [vmem:[%s2139_s22 + $0x10] sm:$0xff]  ;;  %v1822_v47 = vld [vmem:[%s2139_s22 + $0x20] sm:$0xff]  ;;  %v824_v49 = vld [vmem:[%s2149_s29 + $0x68] sm:$0xff] }
  0x4a   : > { %1838 = vmatpush.bf16.xpose.msra.mxu2 %v675_v11  ;;  %1839 = vmatpush.bf16.xpose.msra.mxu3 %v675_v11  ;;  %v1824_v48 = vld [vmem:[%s2139_s22 + $0x30] sm:$0xff]  ;;  %v823_v50 = vld [vmem:[%s2149_s29 + $0x60] sm:$0xff]  ;;  %v822_v51 = vld [vmem:[%s2149_s29 + $0x58] sm:$0xff] }
  0x4b   : > { %v909_v52 = vld [vmem:[%s2159_s18] sm:$0xff]  ;;  %v826_v53 = vld [vmem:[%s2149_s29 + $0x78] sm:$0xff]  ;;  %v825_v54 = vld [vmem:[%s2149_s29 + $0x70] sm:$0xff] }
  0x4c   : > { %v1819_v55 = vld [vmem:[%s2139_s22 + $0x8] sm:$0xff]  ;;  %v1821_v56 = vld [vmem:[%s2139_s22 + $0x18] sm:$0xff]  ;;  %v911_v60 = vld [vmem:[%s2159_s18 + $0x10] sm:$0xff] }
  0x4d   : > { %v1823_v57 = vld [vmem:[%s2139_s22 + $0x28] sm:$0xff]  ;;  %v1825_v58 = vld [vmem:[%s2139_s22 + $0x38] sm:$0xff]  ;;  %v915_v63 = vld [vmem:[%s2159_s18 + $0x30] sm:$0xff] }
  0x4e   : > { %v912_v59 = vld [vmem:[%s2159_s18 + $0x18] sm:$0xff]  ;;  %v910_v61 = vld [vmem:[%s2159_s18 + $0x8] sm:$0xff]  ;;  %v913_v1 = vld [vmem:[%s2159_s18 + $0x20] sm:$0xff] }
  0x4f   : > { %771 = vperm.xlu2 %1904, %v737_v13   ;;  %v914_v0 = vld [vmem:[%s2159_s18 + $0x28] sm:$0xff]  ;;  %v917_v4 = vld [vmem:[%s2159_s18 + $0x40] sm:$0xff]  ;;  %v916_v5 = vld [vmem:[%s2159_s18 + $0x38] sm:$0xff] }
  0x50   : > { %768 = vperm.xlu1 %1903, %v736_v14   ;;  %765 = vperm.xlu0 %1902, %v735_v15   ;;  %v918_v3 = vld [vmem:[%s2159_s18 + $0x48] sm:$0xff]  ;;  %v921_v7 = vld [vmem:[%s2159_s18 + $0x60] sm:$0xff]  ;;  %v920_v8 = vld [vmem:[%s2159_s18 + $0x58] sm:$0xff] }
  0x51   : > { %682 = vmatpush.bf16.xpose.msra.mxu0 %v672_v16  ;;  %1840 = vmatpush.bf16.xpose.msra.mxu1 %v672_v16  ;;  %v919_v9 = vld [vmem:[%s2159_s18 + $0x50] sm:$0xff]  ;;  %v924_v13 = vld [vmem:[%s2159_s18 + $0x78] sm:$0xff]  ;;  %v922_v15 = vld [vmem:[%s2159_s18 + $0x68] sm:$0xff] }
  0x52   : > { %1841 = vmatpush.bf16.xpose.msra.mxu2 %v672_v16  ;;  %1842 = vmatpush.bf16.xpose.msra.mxu3 %v672_v16  ;;  %v923_v14 = vld [vmem:[%s2159_s18 + $0x70] sm:$0xff] }
  0x57   : > { %780 = vperm.xlu2 %1904, %v740_v18  }
  0x58   : > { %777 = vperm.xlu1 %1903, %v739_v19   ;;  %774 = vperm.xlu0 %1902, %v738_v20  }
  0x59   : > { %683 = vmatpush.bf16.xpose.msra.mxu0 %v669_v21  ;;  %1843 = vmatpush.bf16.xpose.msra.mxu1 %v669_v21 }
  0x5a   : > { %1844 = vmatpush.bf16.xpose.msra.mxu2 %v669_v21  ;;  %1845 = vmatpush.bf16.xpose.msra.mxu3 %v669_v21 }
  0x5f   : > { %789 = vperm.xlu2 %1904, %v743_v23  }
  0x60   : > { %786 = vperm.xlu1 %1903, %v742_v24   ;;  %783 = vperm.xlu0 %1902, %v741_v25   ;;  %v2325_v25 = vld [vmem:[%s472_s25] ss:$0 sm:$0xff] }
  0x61   : > { %684 = vmatpush.bf16.xpose.msra.mxu0 %v666_v26  ;;  %1846 = vmatpush.bf16.xpose.msra.mxu1 %v666_v26 }
  0x62   : > { %1847 = vmatpush.bf16.xpose.msra.mxu2 %v666_v26  ;;  %1848 = vmatpush.bf16.xpose.msra.mxu3 %v666_v26  ;;  %v2332_v26 = vld [vmem:[%s469_s14] ss:$0 sm:$0xff] }
  0x67   : > { %832 = vperm.xlu2 %1904, %v812_v28  }
  0x68   : > { %829 = vperm.xlu1 %1903, %v811_v29   ;;  %792 = vperm.xlu0 %1902, %v744_v30  }
  0x69   : > { %685 = vmatpush.bf16.xpose.msra.mxu0 %v663_v31  ;;  %1849 = vmatpush.bf16.xpose.msra.mxu1 %v663_v31 }
  0x6a   : > { %1850 = vmatpush.bf16.xpose.msra.mxu2 %v663_v31  ;;  %1851 = vmatpush.bf16.xpose.msra.mxu3 %v663_v31 }
  0x6f   : > { %841 = vperm.xlu2 %1904, %v815_v33  }
  0x70   : > { %838 = vperm.xlu1 %1903, %v814_v34   ;;  %835 = vperm.xlu0 %1902, %v813_v35  }
  0x71   : > { %686 = vmatpush.bf16.xpose.msra.mxu0 %v660_v36  ;;  %1852 = vmatpush.bf16.xpose.msra.mxu1 %v660_v36 }
  0x72   : > { %1853 = vmatpush.bf16.xpose.msra.mxu2 %v660_v36  ;;  %1854 = vmatpush.bf16.xpose.msra.mxu3 %v660_v36 }
  0x77   : > { %850 = vperm.xlu2 %1904, %v818_v38  }
  0x78   : > { %847 = vperm.xlu1 %1903, %v817_v39   ;;  %844 = vperm.xlu0 %1902, %v816_v40  }
  0x79   : > { %687 = vmatpush.bf16.xpose.msra.mxu0 %v657_v41  ;;  %1855 = vmatpush.bf16.xpose.msra.mxu1 %v657_v41 }
  0x7a   : > { %1856 = vmatpush.bf16.xpose.msra.mxu2 %v657_v41  ;;  %1857 = vmatpush.bf16.xpose.msra.mxu3 %v657_v41 }
  0x7f   : > { %859 = vperm.xlu2 %1904, %v821_v42  }
  0x80   : > { %856 = vperm.xlu1 %1903, %v820_v43   ;;  %853 = vperm.xlu0 %1902, %v819_v44  }
  0x81   : > { %1775 = vmatmul.msk.bf16.vlgmr.msra.gmra.mxu0 %vm631_vm1, %v1818_v45  ;;  %1777 = vmatmul.msk.bf16.vlgmr.msra.gmra.mxu1 %vm631_vm1, %v1820_v46  ;;  %v2818_v46 = vmov 0 }
  0x82   : > { %1779 = vmatmul.msk.bf16.vlgmr.msra.gmra.mxu2 %vm631_vm1, %v1822_v47  ;;  %1781 = vmatmul.msk.bf16.vlgmr.msra.gmra.mxu3 %vm631_vm1, %v1824_v48 }
  0x87   : > { %868 = vperm.xlu2 %1904, %v824_v49  }
  0x88   : > { %865 = vperm.xlu1 %1903, %v823_v50   ;;  %862 = vperm.xlu0 %1902, %v822_v51  }
  0x8f   : > { %927 = vperm.xlu2 %1904, %v909_v52  }
  0x90   : > { %874 = vperm.xlu1 %1903, %v826_v53   ;;  %871 = vperm.xlu0 %1902, %v825_v54  }
  0x91   : > { %1776 = vmatmul.msk.bf16.gmra.mxu0 %vm631_vm1, %v1819_v55  ;;  %1778 = vmatmul.msk.bf16.gmra.mxu1 %vm631_vm1, %v1821_v56 }
  0x92   : > { %1780 = vmatmul.msk.bf16.gmra.mxu2 %vm631_vm1, %v1823_v57  ;;  %1782 = vmatmul.msk.bf16.gmra.mxu3 %vm631_vm1, %v1825_v58 }
  0x97   : > { %936 = vperm.xlu2 %1904, %v912_v59  }
  0x98   : > { %933 = vperm.xlu1 %1903, %v911_v60   ;;  %930 = vperm.xlu0 %1902, %v910_v61  }
  0x99   : > { %v2288_v62 = vpop.permute.xlu2 %759 }
  0x9f   : > { %945 = vperm.xlu2 %1904, %v915_v63  }
  0xa0   : > { %942 = vperm.xlu1 %1903, %v914_v0   ;;  %939 = vperm.xlu0 %1902, %v913_v1  }
  0xa1   : > { %v2293_v2 = vpop.permute.xlu2 %762 }
  0xa7   : > { %954 = vperm.xlu2 %1904, %v918_v3   ;;  %v2404_v3 = vld [vmem:[%s475_s27] ss:$0 sm:$0xff] }
  0xa8   : > { %951 = vperm.xlu1 %1903, %v917_v4   ;;  %948 = vperm.xlu0 %1902, %v916_v5  }
  0xa9   : > { %v2298_v6 = vpop.permute.xlu2 %771 }
  0xaf   : > { %963 = vperm.xlu2 %1904, %v921_v7  }
  0xb0   : > { %960 = vperm.xlu1 %1903, %v920_v8   ;;  %957 = vperm.xlu0 %1902, %v919_v9  }
  0xb1   : > { %v781_v10 = vpop.permute.xlu2 %780 }
  0xb2   : > { %v754_v11 = vpop.permute.xlu1 %753  ;;  %v2303_v12 = vpop.permute.xlu0 %747  ;;  %vm806_vm15 = vcmp.eq.s32.totalorder %v781_v10, %v2325_v25 }
  0xb3   : > { %vm797_vm8 = vcmp.eq.s32.totalorder %v754_v11, %v2325_v25 }
  0xb7   : > { %972 = vperm.xlu2 %1904, %v924_v13   ;;  %v2046_v13 = vmov 0.0  }
  0xb8   : > { %969 = vperm.xlu1 %1903, %v923_v14   ;;  %966 = vperm.xlu0 %1902, %v922_v15  }
  0xb9   : > { %v2308_v16 = vpop.permute.xlu2 %789 }
  0xba   : > { %v757_v17 = vpop.permute.xlu1 %756  ;;  %v2310_v18 = vpop.permute.xlu0 %750 }
  0xbb   : > { %vm798_vm5 = vcmp.eq.s32.totalorder %v757_v17, %v2325_v25 }
  0xc1   : > { %v2312_v19 = vpop.permute.xlu2 %832 }
  0xc2   : > { %v769_v20 = vpop.permute.xlu1 %768  ;;  %v766_v21 = vpop.permute.xlu0 %765 }
  0xc3   : > { %vm802_vm2 = vcmp.eq.s32.totalorder %v769_v20, %v2325_v25  ;;  %vm801_vm11 = vcmp.eq.s32.totalorder %v766_v21, %v2325_v25 }
  0xc9   : > { %v2314_v22 = vpop.permute.xlu2 %841 }
  0xca   : > { %v2316_v23 = vpop.permute.xlu1 %777  ;;  %v2318_v24 = vpop.permute.xlu0 %774 }
  0xd1   : > { %v851_v27 = vpop.permute.xlu2 %850 }
  0xd2   : > { %vm884_vm3 = vcmp.ne.s32.totalorder %v851_v27, %v2332_v26  ;;  %v2336_v28 = vpop.permute.xlu1 %786  ;;  %v784_v29 = vpop.permute.xlu0 %783 }
  0xd3   : > { %vm2338_vm4 = vmand %vm802_vm2, %vm884_vm3 }
  0xd9   : > { %v2362_v40 = vpop.permute.xlu2 %859 }
  0xda   : > { %v830_v31 = vpop.permute.xlu1 %829  ;;  %v793_v32 = vpop.permute.xlu0 %792 }
  0xdb   : > { %vm877_vm2 = vcmp.ne.s32.totalorder %v830_v31, %v2332_v26  ;;  %vm810_vm3 = vcmp.eq.s32.totalorder %v793_v32, %v2325_v25 }
  0xe1   : > { %v2368_v43 = vpop.permute.xlu2 %868 }
  0xe2   : > { %v839_v33 = vpop.permute.xlu1 %838  ;;  %v836_v34 = vpop.permute.xlu0 %835 }
  0xe3   : > { %vm880_vm6 = vcmp.ne.s32.totalorder %v839_v33, %v2332_v26  ;;  %vm879_vm7 = vcmp.ne.s32.totalorder %v836_v34, %v2332_v26 }
  0xe4   : > { %vm2346_vm9 = vmand %vm798_vm5, %vm880_vm6  ;;  %vm795_vm6 = vcmp.eq.s32.totalorder %v2303_v12, %v2325_v25 }
  0xe5   : > { %vm2350_vm10 = vmand %vm797_vm8, %vm879_vm7  ;;  %vm799_vm8 = vcmp.eq.s32.totalorder %v2288_v62, %v2325_v25 }
  0xe6   : > { %vm893_vm7 = vmand %vm795_vm6, %vm877_vm2 }
  0xe9   : > { %v928_v50 = vpop.permute.xlu2 %927 }
  0xea   : > { %v848_v37 = vpop.permute.xlu1 %847  ;;  %v2354_v38 = vpop.permute.xlu0 %844  ;;  %vm975_vm2 = vcmp.eq.s32.totalorder %v928_v50, %v2404_v3 }
  0xeb   : > { %vm883_vm12 = vcmp.ne.s32.totalorder %v848_v37, %v2332_v26  ;;  %v1783_v17 = vsel %vm975_vm2, 1.0, %v2046_v13 }
  0xec   : > { %vm2358_vm13 = vmand %vm801_vm11, %vm883_vm12  ;;  %vm881_vm11 = vcmp.ne.s32.totalorder %v2314_v22, %v2332_v26 }
  0xf1   : > { %v2395_v63 = vpop.permute.xlu2 %936 }
  0xf2   : > { %v2364_v41 = vpop.permute.xlu1 %856  ;;  %v2366_v42 = vpop.permute.xlu0 %853 }
  0xf3   : > { %vm885_vm6 = vcmp.ne.s32.totalorder %v2366_v42, %v2332_v26 }
  0xf9   : > { %v2413_v20 = vpop.permute.xlu2 %945 }
  0xfa   : > { %v866_v44 = vpop.permute.xlu1 %865  ;;  %v863_v45 = vpop.permute.xlu0 %862 }
  0xfb   : > { %vm888_vm14 = vcmp.ne.s32.totalorder %v863_v45, %v2332_v26  ;;  %vm889_vm12 = vcmp.ne.s32.totalorder %v866_v44, %v2332_v26 }
  0xfc   : > { %vm2372_vm0 = vmand %vm806_vm15, %vm888_vm14  ;;  %vm807_vm14 = vcmp.eq.s32.totalorder %v784_v29, %v2325_v25 }
  0xfd   : > { %v2819_v46 = vsel %vm2372_vm0, 4294967295, %v2818_v46  ;;  %vm897_vm15 = vmand %vm799_vm8, %vm881_vm11 }
  0xfe   : > { %v689_v47 = vpop.f32.mrf.mxu0  ;;  %v699_v49 = vpop.f32.mrf.mxu1 }
  0xff   : > { %v1023_v48 = vmul.f32 1.442695, %v689_v47  ;;  %v1031_v53 = vmul.f32 1.442695, %v699_v49 }
 0x101   : > { %1908 = vpow2.f32 %v1023_v48  ;;  %v955_v47 = vpop.permute.xlu2 %954 }
 0x102   : > { %v875_v51 = vpop.permute.xlu1 %874  ;;  %v2376_v52 = vpop.permute.xlu0 %871  ;;  %1910 = vpow2.f32 %v1031_v53 }
 0x103   : > { %vm892_vm1 = vcmp.ne.s32.totalorder %v875_v51, %v2332_v26 }
 0x104   : > { %vm2381_vm5 = vmand %vm810_vm3, %vm892_vm1 }
 0x105   : > { %v719_v54 = vpop.f32.mrf.mxu3  ;;  %v709_v59 = vpop.f32.mrf.mxu2  ;;  %vm905_vm1 = vmand %vm807_vm14, %vm889_vm12  ;;  %vm890_vm12 = vcmp.ne.s32.totalorder %v2368_v43, %v2332_v26  ;;  %vm808_vm14 = vcmp.eq.s32.totalorder %v2336_v28, %v2325_v25 }
 0x106   : > { %v1047_v56 = vmul.f32 1.442695, %v719_v54  ;;  %v1039_v4 = vmul.f32 1.442695, %v709_v59  ;;  %v701_v8 = vpop.f32.mrf.mxu1  ;;  %v691_v21 = vpop.f32.mrf.mxu0  ;;  %vm906_vm2 = vmand %vm808_vm14, %vm890_vm12  ;;  %vm984_vm14 = vcmp.eq.s32.totalorder %v955_v47, %v2404_v3 }
 0x107   : > { %v1909_v57 = vpop.eup %1908  ;;  %v1033_v22 = vmul.f32 1.442695, %v701_v8  ;;  %v1025_v32 = vmul.f32 1.442695, %v691_v21 }
 0x108   : > { %v1055_v58 = vsel %vm893_vm7, %v1909_v57, 0.0  ;;  %1912 = vpow2.f32 %v1047_v56  ;;  %v1911_v0 = vpop.eup %1910  ;;  %vm803_vm7 = vcmp.eq.s32.totalorder %v2298_v6, %v2325_v25 }
 0x109   : > { %1087 = vadd.xlane.f32.xlu0 %v1055_v58  ;;  %v1059_v7 = vsel %vm897_vm15, %v1911_v0, 0.0  ;;  %1914 = vpow2.f32 %v1039_v4  ;;  %v1168_v29 = vmul.f32 %v1783_v17, %v1055_v58  ;;  %vm901_vm8 = vmand %vm803_vm7, %vm885_vm6  ;;  %vm882_vm15 = vcmp.ne.s32.totalorder %v2354_v38, %v2332_v26 }
 0x10a   : > { %v2387_v60 = vpop.permute.xlu1 %933  ;;  %v2389_v61 = vpop.permute.xlu0 %930  ;;  %vm800_vm6 = vcmp.eq.s32.totalorder %v2293_v2, %v2325_v25  ;;  %vm878_vm7 = vcmp.ne.s32.totalorder %v2312_v19, %v2332_v26 }
 0x10d   : > { %v721_v62 = vpop.f32.mrf.mxu3  ;;  %v711_v12 = vpop.f32.mrf.mxu2 }
 0x10e   : > { %v1913_v1 = vpop.eup %1912  ;;  %v1049_v11 = vmul.f32 1.442695, %v721_v62  ;;  %v1041_v27 = vmul.f32 1.442695, %v711_v12  ;;  %v704_v34 = vpop.f32.mrf.mxu1 }
 0x10f   : > { %v2406_v5 = vsel %vm905_vm1, %v1913_v1, 0.0  ;;  %v1915_v31 = vpop.eup %1914  ;;  %v1035_v6 = vmul.f32 1.442695, %v704_v34  ;;  %v694_v51 = vpop.f32.mrf.mxu0 }
 0x110   : > { %1111 = vadd.xlane.f32.xlu2 %v2406_v5  ;;  %1916 = vpow2.f32 %v1049_v11  ;;  %v1063_v44 = vsel %vm901_vm8, %v1915_v31, 0.0  ;;  %vm804_vm8 = vcmp.eq.s32.totalorder %v2318_v24, %v2325_v25  ;;  %v1792_v24 = vsel %vm984_vm14, 1.0, %v2046_v13 }
 0x111   : > { %1095 = vadd.xlane.f32.xlu0 %v1059_v7  ;;  %1918 = vpow2.f32 %v1033_v22  ;;  %v1027_v57 = vmul.f32 1.442695, %v694_v51  ;;  %v1071_v51 = vld [vmem:[#allocation2] sm:$0xff] }
 0x112   : > { %v943_v9 = vpop.permute.xlu1 %942  ;;  %v940_v10 = vpop.permute.xlu0 %939  ;;  %1920 = vpow2.f32 %v1041_v27 }
 0x113   : > { %vm979_vm3 = vcmp.eq.s32.totalorder %v940_v10, %v2404_v3  ;;  %1922 = vpow2.f32 %v1025_v32  ;;  %vm980_vm1 = vcmp.eq.s32.totalorder %v943_v9, %v2404_v3 }
 0x114   : > { %v1787_v14 = vsel %vm979_vm3, 1.0, %v2046_v13  ;;  %vm886_vm3 = vcmp.ne.s32.totalorder %v2364_v41, %v2332_v26  ;;  %v1788_v28 = vsel %vm980_vm1, 1.0, %v2046_v13  ;;  %1924 = vpow2.f32 %v1035_v6 }
 0x115   : > { %v1172_v15 = vmul.f32 %v1787_v14, %v1059_v7  ;;  %vm902_vm12 = vmand %vm804_vm8, %vm886_vm3  ;;  %v714_v54 = vpop.f32.mrf.mxu2  ;;  %1926 = vpow2.f32 %v1027_v57  ;;  %v724_v0 = vpop.f32.mrf.mxu3  ;;  %vm805_vm1 = vcmp.eq.s32.totalorder %v2316_v23, %v2325_v25 }
 0x116   : > { %v1917_v42 = vpop.eup %1916  ;;  %v1043_v58 = vmul.f32 1.442695, %v714_v54  ;;  %v706_v4 = vpop.f32.mrf.mxu1  ;;  %v1051_v62 = vmul.f32 1.442695, %v724_v0  ;;  %v1083_v54 = vld [vmem:[#allocation2 + $0x60] sm:$0xff] }
 0x117   : > { %1192 = vadd.xlane.f32.xlu1 %v1172_v15  ;;  %v1919_v43 = vpop.eup %1918  ;;  %v2430_v48 = vsel %vm906_vm2, %v1917_v42, 0.0  ;;  %vm796_vm2 = vcmp.eq.s32.totalorder %v2310_v18, %v2325_v25  ;;  %v1037_v9 = vmul.f32 1.442695, %v706_v4  ;;  %v696_v10 = vpop.f32.mrf.mxu0 }
 0x118   : > { %v1921_v49 = vpop.eup %1920  ;;  %vm894_vm0 = vmand %vm796_vm2, %vm878_vm7  ;;  %1928 = vpow2.f32 %v1043_v58  ;;  %v1029_v14 = vmul.f32 1.442695, %v696_v10  ;;  %vm809_vm7 = vcmp.eq.s32.totalorder %v2308_v16, %v2325_v25  ;;  %vm2822_vm2 = vnez %v2819_v46 }
 0x119   : > { %1184 = vadd.xlane.f32.xlu0 %v1168_v29  ;;  %v1923_v41 = vpop.eup %1922  ;;  %v1064_v50 = vsel %vm902_vm12, %v1921_v49, 0.0  ;;  %1930 = vpow2.f32 %v1051_v62  ;;  %vm978_vm12 = vcmp.eq.s32.totalorder %v2395_v63, %v2404_v3  ;;  %v964_v29 = vpop.permute.xlu2 %963  ;;  %v1160_v62 = vld [vmem:[#allocation3 + $0x40] sm:$0xff] }
 0x11a   : > { %v952_v33 = vpop.permute.xlu1 %951  ;;  %v1056_v53 = vsel %vm894_vm0, %v1923_v41, 0.0  ;;  %v1177_v38 = vmul.f32 %v1792_v24, %v1064_v50  ;;  %v1925_v56 = vpop.eup %1924  ;;  %vm976_vm0 = vcmp.eq.s32.totalorder %v2389_v61, %v2404_v3  ;;  %1932 = vpow2.f32 %v1037_v9 }
 0x11b   : > { %vm983_vm11 = vcmp.eq.s32.totalorder %v952_v33, %v2404_v3  ;;  %v1061_v18 = vsel %vm2358_vm13, %v1925_v56, 0.0  ;;  %v949_v7 = vpop.permute.xlu0 %948  ;;  %v1927_v8 = vpop.eup %1926  ;;  %vm887_vm13 = vcmp.ne.s32.totalorder %v2362_v40, %v2332_v26  ;;  %v1784_v39 = vsel %vm976_vm0, 1.0, %v2046_v13  ;;  %v1075_v56 = vld [vmem:[#allocation2 + $0x20] sm:$0xff] }
 0x11c   : > { %v1791_v37 = vsel %vm983_vm11, 1.0, %v2046_v13  ;;  %vm898_vm11 = vmand %vm800_vm6, %vm882_vm15  ;;  %vm981_vm15 = vcmp.eq.s32.totalorder %v2413_v20, %v2404_v3  ;;  %v1169_v12 = vmul.f32 %v1784_v39, %v1056_v53  ;;  %v1057_v61 = vsel %vm2350_vm10, %v1927_v8, 0.0  ;;  %v1084_v39 = vld [vmem:[#allocation2 + $0x68] sm:$0xff] }
 0x11d   : > { %v1176_v45 = vmul.f32 %v1791_v37, %v1063_v44  ;;  %v1060_v2 = vsel %vm898_vm11, %v1919_v43, 0.0  ;;  %v1789_v59 = vsel %vm981_vm15, 1.0, %v2046_v13  ;;  %vm903_vm3 = vmand %vm805_vm1, %vm887_vm13  ;;  %vm891_vm6 = vcmp.ne.s32.totalorder %v2376_v52, %v2332_v26  ;;  %v726_v25 = vpop.f32.mrf.mxu3  ;;  %v716_v31 = vpop.f32.mrf.mxu2 }
 0x11e   : > { %v1173_v19 = vmul.f32 %v1788_v28, %v1060_v2  ;;  %v1174_v1 = vmul.f32 %v1789_v59, %v1061_v18  ;;  %v1929_v11 = vpop.eup %1928  ;;  %1934 = vpow2.f32 %v1029_v14  ;;  %vm907_vm8 = vmand %vm809_vm7, %vm891_vm6  ;;  %vm977_vm11 = vcmp.eq.s32.totalorder %v2387_v60, %v2404_v3  ;;  %v1152_v59 = vld [vmem:[#allocation3] sm:$0xff]  ;;  %v1157_v14 = vld [vmem:[#allocation3 + $0x28] sm:$0xff] }
 0x11f   : > { %1200 = vadd.xlane.f32.xlu2 %v1176_v45  ;;  %1103 = vadd.xlane.f32.xlu1 %v1063_v44  ;;  %v1065_v15 = vsel %vm903_vm3, %v1929_v11, 0.0  ;;  %v1931_v40 = vpop.eup %1930  ;;  %v1785_v16 = vsel %vm977_vm11, 1.0, %v2046_v13  ;;  %v1786_v30 = vsel %vm978_vm12, 1.0, %v2046_v13  ;;  %v1053_v32 = vmul.f32 1.442695, %v726_v25  ;;  %v1076_v25 = vld [vmem:[#allocation2 + $0x28] sm:$0xff] }
 0x120   : > { %v1933_v23 = vpop.eup %1932  ;;  %v1069_v36 = vsel %vm907_vm8, %v1931_v40, 0.0  ;;  %v1170_v27 = vmul.f32 %v1785_v16, %v1057_v61  ;;  %vm982_vm14 = vcmp.eq.s32.totalorder %v949_v7, %v2404_v3  ;;  %v1045_v63 = vmul.f32 1.442695, %v716_v31  ;;  %v1079_v7 = vld [vmem:[#allocation2 + $0x40] sm:$0xff]  ;;  %v1080_v16 = vld [vmem:[#allocation2 + $0x48] sm:$0xff] }
 0x121   : > { %1113 = vadd.xlane.f32.xlu0 %v2430_v48  ;;  %v1062_v20 = vsel %vm2338_vm4, %v1933_v23, 0.0  ;;  %vm987_vm4 = vcmp.eq.s32.totalorder %v964_v29, %v2404_v3  ;;  %1936 = vpow2.f32 %v1053_v32  ;;  %v1790_v33 = vsel %vm982_vm14, 1.0, %v2046_v13  ;;  %v973_v44 = vpop.permute.xlu2 %972  ;;  %v1161_v23 = vld [vmem:[#allocation3 + $0x48] sm:$0xff] }
 0x122   : > { %v1795_v35 = vsel %vm987_vm4, 1.0, %v2046_v13  ;;  %1938 = vpow2.f32 %v1045_v63  ;;  %v1175_v34 = vmul.f32 %v1790_v33, %v1062_v20  ;;  %v961_v45 = vpop.permute.xlu1 %960  ;;  %vm1135_vm13 = vcmask 7168   ;;  %v1073_v63 = vld [vmem:[#allocation2 + $0x10] sm:$0xff] }
 0x123   : > { %v958_v17 = vpop.permute.xlu0 %957  ;;  %v1180_v37 = vmul.f32 %v1795_v35, %v2406_v5  ;;  %vm986_vm15 = vcmp.eq.s32.totalorder %v961_v45, %v2404_v3 }
 0x124   : > { %vm985_vm10 = vcmp.eq.s32.totalorder %v958_v17, %v2404_v3  ;;  %v1935_v21 = vpop.eup %1934  ;;  %v1794_v41 = vsel %vm986_vm15, 1.0, %v2046_v13 }
 0x125   : > { %v1793_v26 = vsel %vm985_vm10, 1.0, %v2046_v13  ;;  %v1058_v52 = vsel %vm2346_vm9, %v1935_v21, 0.0  ;;  %vm990_vm9 = vcmp.eq.s32.totalorder %v973_v44, %v2404_v3 }
 0x126   : > { %v1178_v22 = vmul.f32 %v1793_v26, %v1065_v15  ;;  %v1171_v60 = vmul.f32 %v1786_v30, %v1058_v52  ;;  %v1798_v49 = vsel %vm990_vm9, 1.0, %v2046_v13 }
 0x127   : > { %1194 = vadd.xlane.f32.xlu2 %v1173_v19  ;;  %1089 = vadd.xlane.f32.xlu1 %v1056_v53  ;;  %v1937_v42 = vpop.eup %1936 }
 0x128   : > { %v1939_v6 = vpop.eup %1938  ;;  %v1070_v47 = vsel %vm2381_vm5, %v1937_v42, 0.0 }
 0x129   : > { %1202 = vadd.xlane.f32.xlu0 %v1177_v38  ;;  %v1066_v28 = vsel %vm2822_vm2, %v1939_v6, 0.0  ;;  %v1183_v5 = vmul.f32 %v1798_v49, %v1070_v47  ;;  %v1085_v6 = vld [vmem:[#allocation2 + $0x70] sm:$0xff] }
 0x12a   : > { %v1179_v19 = vmul.f32 %v1794_v41, %v1066_v28 }
 0x12b   : > { %v967_v43 = vpop.permute.xlu0 %966 }
 0x12c   : > { %vm988_vm0 = vcmp.eq.s32.totalorder %v967_v43, %v2404_v3  ;;  %v1077_v43 = vld [vmem:[#allocation2 + $0x30] sm:$0xff] }
 0x12f   : > { %1105 = vadd.xlane.f32.xlu2 %v1064_v50  ;;  %1097 = vadd.xlane.f32.xlu1 %v1060_v2  ;;  %v1796_v2 = vsel %vm988_vm0, 1.0, %v2046_v13  ;;  %v970_v50 = vpop.permute.xlu1 %969 }
 0x130   : > { %v1181_v55 = vmul.f32 %v1796_v2, %v2430_v48  ;;  %vm989_vm5 = vcmp.eq.s32.totalorder %v970_v50, %v2404_v3  ;;  %v1156_v3 = vld [vmem:[#allocation3 + $0x20] sm:$0xff] }
 0x131   : > { %1196 = vadd.xlane.f32.xlu0 %v1174_v1  ;;  %v1797_v46 = vsel %vm989_vm5, 1.0, %v2046_v13 }
 0x132   : > { %v1182_v24 = vmul.f32 %v1797_v46, %v1069_v36 }
 0x137   : > { %1186 = vadd.xlane.f32.xlu1 %v1169_v12  ;;  %1091 = vadd.xlane.f32.xlu2 %v1057_v61 }
 0x139   : > { %1107 = vadd.xlane.f32.xlu0 %v1065_v15  ;;  %v1072_v15 = vld [vmem:[#allocation2 + $0x8] sm:$0xff] }
 0x13f   : > { %1115 = vadd.xlane.f32.xlu1 %v1069_v36  ;;  %1099 = vadd.xlane.f32.xlu2 %v1061_v18 }
 0x141   : > { %1101 = vadd.xlane.f32.xlu0 %v1062_v20 }
 0x147   : > { %1204 = vadd.xlane.f32.xlu1 %v1178_v22  ;;  %1188 = vadd.xlane.f32.xlu2 %v1170_v27  ;;  %v1158_v27 = vld [vmem:[#allocation3 + $0x30] sm:$0xff] }
 0x149   : > { %1190 = vadd.xlane.f32.xlu0 %v1171_v60  ;;  %v1153_v60 = vld [vmem:[#allocation3 + $0x8] sm:$0xff] }
 0x14f   : > { %1198 = vadd.xlane.f32.xlu1 %v1175_v34  ;;  %1093 = vadd.xlane.f32.xlu2 %v1058_v52  ;;  %v1081_v34 = vld [vmem:[#allocation2 + $0x50] sm:$0xff] }
 0x151   : > { %1208 = vadd.xlane.f32.xlu0 %v1180_v37 }
 0x157   : > { %1109 = vadd.xlane.f32.xlu1 %v1066_v28  ;;  %1117 = vadd.xlane.f32.xlu2 %v1070_v47  ;;  %v1078_v28 = vld [vmem:[#allocation2 + $0x38] sm:$0xff] }
 0x159   : > { %1214 = vadd.xlane.f32.xlu0 %v1183_v5 }
 0x15f   : > { %1210 = vadd.xlane.f32.xlu1 %v1181_v55  ;;  %1206 = vadd.xlane.f32.xlu2 %v1179_v19  ;;  %v1162_v55 = vld [vmem:[#allocation3 + $0x50] sm:$0xff] }
 0x160   : > { %v1154_v19 = vld [vmem:[#allocation3 + $0x10] sm:$0xff] }
 0x167   : > { %1212 = vadd.xlane.f32.xlu2 %v1182_v24 }
 0x17c   : > { %v1088_v53 = vpop.xlane.xlu0 %1087 }
 0x17d   : > { %v1119_v38 = vadd.f32 %v1088_v53, %v1071_v51  ;;  %v1155_v51 = vld [vmem:[#allocation3 + $0x18] sm:$0xff] }
 0x17f   : > { %1136 = vst.msk [vmem:[#allocation2] sm:$0xff] %vm1135_vm13, %v1119_v38 }
 0x183   : > { %v1112_v57 = vpop.xlane.xlu2 %1111 }
 0x184   : > { %v1096_v58 = vpop.xlane.xlu0 %1095  ;;  %v1131_v48 = vadd.f32 %v1112_v57, %v1083_v54  ;;  %v1159_v57 = vld [vmem:[#allocation3 + $0x38] sm:$0xff] }
 0x185   : > { %v1123_v18 = vadd.f32 %v1096_v58, %v1075_v56  ;;  %v1074_v58 = vld [vmem:[#allocation2 + $0x18] sm:$0xff] }
 0x186   : > { %1148 = vst.msk [vmem:[#allocation2 + $0x60] sm:$0xff] %vm1135_vm13, %v1131_v48 }
 0x187   : > { %1140 = vst.msk [vmem:[#allocation2 + $0x20] sm:$0xff] %vm1135_vm13, %v1123_v18 }
 0x18a   : > { %v1193_v13 = vpop.xlane.xlu1 %1192 }
 0x18b   : > { %v1220_v0 = vadd.f32 %v1193_v13, %v1156_v3  ;;  %v1164_v3 = vld [vmem:[#allocation3 + $0x60] sm:$0xff] }
 0x18c   : > { %v1185_v1 = vpop.xlane.xlu0 %1184 }
 0x18d   : > { %1236 = vst.msk [vmem:[#allocation3 + $0x20] sm:$0xff] %vm1135_vm13, %v1220_v0  ;;  %v1216_v4 = vadd.f32 %v1185_v1, %v1152_v59 }
 0x18f   : > { %1232 = vst.msk [vmem:[#allocation3] sm:$0xff] %vm1135_vm13, %v1216_v4  ;;  %v1082_v4 = vld [vmem:[#allocation2 + $0x58] sm:$0xff] }
 0x192   : > { %v1201_v8 = vpop.xlane.xlu2 %1200  ;;  %v1104_v9 = vpop.xlane.xlu1 %1103 }
 0x193   : > { %v1224_v10 = vadd.f32 %v1201_v8, %v1160_v62  ;;  %v1127_v11 = vadd.f32 %v1104_v9, %v1079_v7  ;;  %v1086_v62 = vld [vmem:[#allocation2 + $0x78] sm:$0xff] }
 0x194   : > { %v1114_v12 = vpop.xlane.xlu0 %1113  ;;  %v1167_v9 = vld [vmem:[#allocation3 + $0x78] sm:$0xff] }
 0x195   : > { %1240 = vst.msk [vmem:[#allocation3 + $0x40] sm:$0xff] %vm1135_vm13, %v1224_v10  ;;  %v1132_v61 = vadd.f32 %v1114_v12, %v1084_v39 }
 0x196   : > { %1144 = vst.msk [vmem:[#allocation2 + $0x40] sm:$0xff] %vm1135_vm13, %v1127_v11 }
 0x197   : > { %1149 = vst.msk [vmem:[#allocation2 + $0x68] sm:$0xff] %vm1135_vm13, %v1132_v61  ;;  %v1165_v61 = vld [vmem:[#allocation3 + $0x68] sm:$0xff] }
 0x19a   : > { %v1195_v40 = vpop.xlane.xlu2 %1194  ;;  %v1090_v17 = vpop.xlane.xlu1 %1089 }
 0x19b   : > { %v1221_v36 = vadd.f32 %v1195_v40, %v1157_v14  ;;  %v1120_v20 = vadd.f32 %v1090_v17, %v1072_v15  ;;  %v1163_v14 = vld [vmem:[#allocation3 + $0x58] sm:$0xff] }
 0x19c   : > { %v1203_v21 = vpop.xlane.xlu0 %1202 }
 0x19d   : > { %1237 = vst.msk [vmem:[#allocation3 + $0x28] sm:$0xff] %vm1135_vm13, %v1221_v36  ;;  %v1225_v26 = vadd.f32 %v1203_v21, %v1161_v23  ;;  %v1166_v36 = vld [vmem:[#allocation3 + $0x70] sm:$0xff] }
 0x19e   : > { %1137 = vst.msk [vmem:[#allocation2 + $0x8] sm:$0xff] %vm1135_vm13, %v1120_v20 }
 0x19f   : > { %1241 = vst.msk [vmem:[#allocation3 + $0x48] sm:$0xff] %vm1135_vm13, %v1225_v26 }
 0x1a2   : > { %v1106_v52 = vpop.xlane.xlu2 %1105  ;;  %v1098_v22 = vpop.xlane.xlu1 %1097 }
 0x1a3   : > { %v1128_v30 = vadd.f32 %v1106_v52, %v1080_v16  ;;  %v1124_v29 = vadd.f32 %v1098_v22, %v1076_v25 }
 0x1a4   : > { %v1197_v31 = vpop.xlane.xlu0 %1196 }
 0x1a5   : > { %1145 = vst.msk [vmem:[#allocation2 + $0x48] sm:$0xff] %vm1135_vm13, %v1128_v30  ;;  %v1222_v32 = vadd.f32 %v1197_v31, %v1158_v27 }
 0x1a6   : > { %1141 = vst.msk [vmem:[#allocation2 + $0x28] sm:$0xff] %vm1135_vm13, %v1124_v29 }
 0x1a7   : > { %1238 = vst.msk [vmem:[#allocation3 + $0x30] sm:$0xff] %vm1135_vm13, %v1222_v32 }
 0x1aa   : > { %v1187_v35 = vpop.xlane.xlu1 %1186  ;;  %v1092_v33 = vpop.xlane.xlu2 %1091 }
 0x1ab   : > { %v1217_v37 = vadd.f32 %v1187_v35, %v1153_v60  ;;  %v1121_v44 = vadd.f32 %v1092_v33, %v1073_v63 }
 0x1ac   : > { %v1108_v42 = vpop.xlane.xlu0 %1107 }
 0x1ad   : > { %1233 = vst.msk [vmem:[#allocation3 + $0x8] sm:$0xff] %vm1135_vm13, %v1217_v37  ;;  %v1129_v45 = vadd.f32 %v1108_v42, %v1081_v34 }
 0x1ae   : > { %1138 = vst.msk [vmem:[#allocation2 + $0x10] sm:$0xff] %vm1135_vm13, %v1121_v44 }
 0x1af   : > { %1146 = vst.msk [vmem:[#allocation2 + $0x50] sm:$0xff] %vm1135_vm13, %v1129_v45 }
 0x1b2   : > { %v1116_v47 = vpop.xlane.xlu1 %1115  ;;  %v1100_v49 = vpop.xlane.xlu2 %1099 }
 0x1b3   : > { %v1133_v5 = vadd.f32 %v1116_v47, %v1085_v6  ;;  %v1125_v41 = vadd.f32 %v1100_v49, %v1077_v43 }
 0x1b4   : > { %v1102_v2 = vpop.xlane.xlu0 %1101 }
 0x1b5   : > { %1150 = vst.msk [vmem:[#allocation2 + $0x70] sm:$0xff] %vm1135_vm13, %v1133_v5  ;;  %v1126_v50 = vadd.f32 %v1102_v2, %v1078_v28 }
 0x1b6   : > { %1142 = vst.msk [vmem:[#allocation2 + $0x30] sm:$0xff] %vm1135_vm13, %v1125_v41 }
 0x1b7   : > { %1143 = vst.msk [vmem:[#allocation2 + $0x38] sm:$0xff] %vm1135_vm13, %v1126_v50 }
 0x1ba   : > { %v1205_v46 = vpop.xlane.xlu1 %1204  ;;  %v1189_v24 = vpop.xlane.xlu2 %1188 }
 0x1bb   : > { %v1226_v53 = vadd.f32 %v1205_v46, %v1162_v55  ;;  %v1218_v38 = vadd.f32 %v1189_v24, %v1154_v19 }
 0x1bc   : > { %v1191_v54 = vpop.xlane.xlu0 %1190 }
 0x1bd   : > { %1242 = vst.msk [vmem:[#allocation3 + $0x50] sm:$0xff] %vm1135_vm13, %v1226_v53  ;;  %v1219_v56 = vadd.f32 %v1191_v54, %v1155_v51 }
 0x1be   : > { %1234 = vst.msk [vmem:[#allocation3 + $0x10] sm:$0xff] %vm1135_vm13, %v1218_v38 }
 0x1bf   : > { %1235 = vst.msk [vmem:[#allocation3 + $0x18] sm:$0xff] %vm1135_vm13, %v1219_v56 }
 0x1c2   : > { %v1199_v48 = vpop.xlane.xlu1 %1198  ;;  %v1094_v18 = vpop.xlane.xlu2 %1093 }
 0x1c3   : > { %v1223_v13 = vadd.f32 %v1199_v48, %v1159_v57  ;;  %v1122_v59 = vadd.f32 %v1094_v18, %v1074_v58 }
 0x1c4   : > { %v1209_v0 = vpop.xlane.xlu0 %1208 }
 0x1c5   : > { %1239 = vst.msk [vmem:[#allocation3 + $0x38] sm:$0xff] %vm1135_vm13, %v1223_v13  ;;  %v1228_v1 = vadd.f32 %v1209_v0, %v1164_v3 }
 0x1c6   : > { %1139 = vst.msk [vmem:[#allocation2 + $0x18] sm:$0xff] %vm1135_vm13, %v1122_v59 }
 0x1c7   : > { %1244 = vst.msk [vmem:[#allocation3 + $0x60] sm:$0xff] %vm1135_vm13, %v1228_v1 }
 0x1ca   : > { %v1110_v7 = vpop.xlane.xlu1 %1109  ;;  %v1118_v8 = vpop.xlane.xlu2 %1117 }
 0x1cb   : > { %v1130_v39 = vadd.f32 %v1110_v7, %v1082_v4  ;;  %v1134_v10 = vadd.f32 %v1118_v8, %v1086_v62 }
 0x1cc   : > { %v1215_v11 = vpop.xlane.xlu0 %1214 }
 0x1cd   : > { %1147 = vst.msk [vmem:[#allocation2 + $0x58] sm:$0xff] %vm1135_vm13, %v1130_v39  ;;  %v1231_v12 = vadd.f32 %v1215_v11, %v1167_v9 }
 0x1ce   : > { %1151 = vst.msk [vmem:[#allocation2 + $0x78] sm:$0xff] %vm1135_vm13, %v1134_v10 }
 0x1cf   : > { %1247 = vst.msk [vmem:[#allocation3 + $0x78] sm:$0xff] %vm1135_vm13, %v1231_v12 }
 0x1d2   : > { %v1211_v15 = vpop.xlane.xlu1 %1210  ;;  %v1207_v40 = vpop.xlane.xlu2 %1206 }
 0x1d3   : > { %v1229_v17 = vadd.f32 %v1211_v15, %v1165_v61  ;;  %v1227_v23 = vadd.f32 %v1207_v40, %v1163_v14 }
 0x1d5   : > { %1245 = vst.msk [vmem:[#allocation3 + $0x68] sm:$0xff] %vm1135_vm13, %v1229_v17 }
 0x1d6   : > { %1243 = vst.msk [vmem:[#allocation3 + $0x58] sm:$0xff] %vm1135_vm13, %v1227_v23 }
 0x1d9   : > { %1251 = sbr.rel (%p1799_p10) target bundleno = 561 (0x231), region = 60 }
 0x1da   : > { %v1213_v20 = vpop.xlane.xlu2 %1212 }
 0x1db   : > { %v1230_v21 = vadd.f32 %v1213_v20, %v1166_v36 }
 0x1dd   : > { %1246 = vst.msk [vmem:[#allocation3 + $0x70] sm:$0xff] %vm1135_vm13, %v1230_v21 }
 0x1de   : > { %v1252_v26 = vld [vmem:[#allocation2] sm:$0xff]  ;;  %v1253_v16 = vld [vmem:[#allocation2 + $0x8] sm:$0xff]  ;;  %v1254_v25 = vld [vmem:[#allocation2 + $0x10] sm:$0xff] }
 0x1df   : > { %v1255_v52 = vld [vmem:[#allocation2 + $0x18] sm:$0xff]  ;;  %v1300_v22 = vmax.f32 %v1252_v26, 1e-30  ;;  %v1256_v27 = vld [vmem:[#allocation2 + $0x20] sm:$0xff]  ;;  %v1301_v30 = vmax.f32 %v1253_v16, 1e-30 }
 0x1e0   : > { %v1302_v29 = vmax.f32 %v1254_v25, 1e-30  ;;  %v1257_v31 = vld [vmem:[#allocation2 + $0x28] sm:$0xff]  ;;  %v1258_v32 = vld [vmem:[#allocation2 + $0x30] sm:$0xff]  ;;  %v1303_v60 = vmax.f32 %v1255_v52, 1e-30 }
 0x1e1   : > { %v1259_v63 = vld [vmem:[#allocation2 + $0x38] sm:$0xff]  ;;  %v1304_v35 = vmax.f32 %v1256_v27, 1e-30  ;;  %1940 = vlog2.f32 %v1300_v22  ;;  %v1260_v33 = vld [vmem:[#allocation2 + $0x40] sm:$0xff]  ;;  %v1261_v34 = vld [vmem:[#allocation2 + $0x48] sm:$0xff] }
 0x1e2   : > { %1942 = vlog2.f32 %v1301_v30  ;;  %v1305_v37 = vmax.f32 %v1257_v31, 1e-30  ;;  %v1306_v44 = vmax.f32 %v1258_v32, 1e-30  ;;  %v1262_v42 = vld [vmem:[#allocation2 + $0x50] sm:$0xff]  ;;  %v1263_v6 = vld [vmem:[#allocation2 + $0x58] sm:$0xff] }
 0x1e3   : > { %1944 = vlog2.f32 %v1302_v29  ;;  %v1307_v45 = vmax.f32 %v1259_v63, 1e-30  ;;  %v1308_v43 = vmax.f32 %v1260_v33, 1e-30  ;;  %v1264_v47 = vld [vmem:[#allocation2 + $0x60] sm:$0xff]  ;;  %v1265_v5 = vld [vmem:[#allocation2 + $0x68] sm:$0xff] }
 0x1e4   : > { %1946 = vlog2.f32 %v1303_v60  ;;  %v1309_v49 = vmax.f32 %v1261_v34, 1e-30  ;;  %v1310_v41 = vmax.f32 %v1262_v42, 1e-30  ;;  %v1266_v50 = vld [vmem:[#allocation2 + $0x70] sm:$0xff]  ;;  %v2528_v46 = vld [vmem:[#allocation3] sm:$0xff] }
 0x1e5   : > { %1948 = vlog2.f32 %v1304_v35  ;;  %v1311_v55 = vmax.f32 %v1263_v6, 1e-30  ;;  %v1312_v24 = vmax.f32 %v1264_v47, 1e-30  ;;  %v2530_v53 = vld [vmem:[#allocation3 + $0x8] sm:$0xff]  ;;  %v2532_v56 = vld [vmem:[#allocation3 + $0x10] sm:$0xff] }
 0x1e6   : > { %1950 = vlog2.f32 %v1305_v37  ;;  %v1313_v38 = vmax.f32 %v1265_v5, 1e-30  ;;  %v1314_v57 = vmax.f32 %v1266_v50, 1e-30  ;;  %v2534_v48 = vld [vmem:[#allocation3 + $0x18] sm:$0xff]  ;;  %v2537_v13 = vld [vmem:[#allocation3 + $0x20] sm:$0xff] }
 0x1e7   : > { %v1941_v28 = vpop.eup %1940  ;;  %1952 = vlog2.f32 %v1306_v44  ;;  %v1348_v18 = vmax.f32 %v2528_v46, 1e-30  ;;  %v1349_v59 = vmax.f32 %v2530_v53, 1e-30  ;;  %v2540_v1 = vld [vmem:[#allocation3 + $0x28] sm:$0xff]  ;;  %v1267_v7 = vld [vmem:[#allocation2 + $0x78] sm:$0xff] }
 0x1e8   : > { %v1943_v2 = vpop.eup %1942  ;;  %1954 = vlog2.f32 %v1307_v45  ;;  %v1350_v4 = vmax.f32 %v2532_v56, 1e-30  ;;  %v2545_v8 = vld [vmem:[#allocation3 + $0x30] sm:$0xff]  ;;  %v1351_v9 = vmax.f32 %v2534_v48, 1e-30  ;;  %v2550_v10 = vld [vmem:[#allocation3 + $0x38] sm:$0xff] }
 0x1e9   : > { %v1945_v19 = vpop.eup %1944  ;;  %1956 = vlog2.f32 %v1308_v43  ;;  %v2552_v11 = vld [vmem:[#allocation3 + $0x40] sm:$0xff]  ;;  %vm1284_vm1 = vcmp.gt.f32.partialorder %v2528_v46, 0.0  ;;  %vm1285_vm3 = vcmp.gt.f32.partialorder %v2530_v53, 0.0  ;;  %v1352_v12 = vmax.f32 %v2537_v13, 1e-30  ;;  %v2559_v14 = vld [vmem:[#allocation3 + $0x48] sm:$0xff] }
 0x1ea   : > { %v1947_v51 = vpop.eup %1946  ;;  %1958 = vlog2.f32 %v1309_v49  ;;  %v2561_v15 = vld [vmem:[#allocation3 + $0x50] sm:$0xff]  ;;  %v2563_v40 = vld [vmem:[#allocation3 + $0x58] sm:$0xff]  ;;  %vm1286_vm6 = vcmp.gt.f32.partialorder %v2532_v56, 0.0  ;;  %vm1287_vm7 = vcmp.gt.f32.partialorder %v2534_v48, 0.0  ;;  %v1353_v17 = vmax.f32 %v2540_v1, 1e-30 }
 0x1eb   : > { %v1949_v54 = vpop.eup %1948  ;;  %1960 = vlog2.f32 %v1310_v41  ;;  %v2570_v36 = vld [vmem:[#allocation3 + $0x60] sm:$0xff]  ;;  %v2572_v20 = vld [vmem:[#allocation3 + $0x68] sm:$0xff]  ;;  %v1315_v21 = vmax.f32 %v1267_v7, 1e-30  ;;  %v1354_v26 = vmax.f32 %v2545_v8, 1e-30 }
 0x1ec   : > { %v1951_v58 = vpop.eup %1950  ;;  %1962 = vlog2.f32 %v1311_v55  ;;  %v2577_v25 = vld [vmem:[#allocation3 + $0x70] sm:$0xff]  ;;  %v1317_v52 = vmul.f32 0.6931472, %v1941_v28  ;;  %v2579_v22 = vmul.f32 0.6931472, %v1943_v2  ;;  %v2584_v29 = vld [vmem:[#allocation3 + $0x78] sm:$0xff] }
 0x1ed   : > { %v1953_v3 = vpop.eup %1952  ;;  %1964 = vlog2.f32 %v1312_v24  ;;  %v1355_v27 = vmax.f32 %v2550_v10, 1e-30  ;;  %vm1288_vm8 = vcmp.gt.f32.partialorder %v2537_v13, 0.0  ;;  %v2587_v31 = vmul.f32 0.6931472, %v1945_v19 }
 0x1ee   : > { %v1955_v0 = vpop.eup %1954  ;;  %1966 = vlog2.f32 %v1313_v38  ;;  %v2589_v32 = vmul.f32 0.6931472, %v1947_v51  ;;  %v2591_v60 = vmul.f32 0.6931472, %v1949_v54  ;;  %v2595_v35 = vmul.f32 0.6931472, %v1951_v58 }
 0x1ef   : > { %v2543_v62 = vpop.eup %1956  ;;  %1968 = vlog2.f32 %v1314_v57  ;;  %v1356_v33 = vmax.f32 %v2552_v11, 1e-30  ;;  %v1357_v34 = vmax.f32 %v2559_v14, 1e-30  ;;  %vm1289_vm10 = vcmp.gt.f32.partialorder %v2540_v1, 0.0 }
 0x1f0   : > { %v2548_v39 = vpop.eup %1958  ;;  %1970 = vlog2.f32 %v1348_v18  ;;  %v2600_v44 = vmul.f32 0.6931472, %v1953_v3  ;;  %v1358_v42 = vmax.f32 %v2561_v15, 1e-30  ;;  %v1359_v45 = vmax.f32 %v2563_v40, 1e-30 }
 0x1f1   : > { %v2557_v61 = vpop.eup %1960  ;;  %1972 = vlog2.f32 %v1349_v59  ;;  %v1360_v43 = vmax.f32 %v2570_v36, 1e-30  ;;  %v1361_v47 = vmax.f32 %v2572_v20, 1e-30  ;;  %v2606_v5 = vmul.f32 0.6931472, %v1955_v0 }
 0x1f2   : > { %v2568_v23 = vpop.eup %1962  ;;  %1974 = vlog2.f32 %v1350_v4  ;;  %v1362_v41 = vmax.f32 %v2577_v25, 1e-30  ;;  %v1363_v55 = vmax.f32 %v2584_v29, 1e-30  ;;  %vm1290_vm11 = vcmp.gt.f32.partialorder %v2545_v8, 0.0 }
 0x1f3   : > { %v2575_v16 = vpop.eup %1964  ;;  %1976 = vlog2.f32 %v1351_v9  ;;  %v2047_v57 = vmov 0.0   ;;  %v2619_v59 = vmul.f32 0.6931472, %v2543_v62  ;;  %v2622_v0 = vmul.f32 0.6931472, %v2548_v39 }
 0x1f4   : > { %v2582_v30 = vpop.eup %1966  ;;  %1978 = vlog2.f32 %v1352_v12  ;;  %v1800_v58 = vsel %vm1284_vm1, 1.0, %v2047_v57  ;;  %v1801_v18 = vsel %vm1285_vm3, 1.0, %v2047_v57  ;;  %vm1291_vm12 = vcmp.gt.f32.partialorder %v2550_v10, 0.0 }
 0x1f5   : > { %v2593_v63 = vpop.eup %1968  ;;  %1980 = vlog2.f32 %v1353_v17  ;;  %v1802_v17 = vsel %vm1286_vm6, 1.0, %v2047_v57  ;;  %v2632_v62 = vsel %vm1287_vm7, 1.0, %v2047_v57  ;;  %vm1292_vm4 = vcmp.gt.f32.partialorder %v2552_v11, 0.0 }
 0x1f6   : > { %v1971_v37 = vpop.eup %1970  ;;  %1982 = vlog2.f32 %v1354_v26  ;;  %v1499_v26 = vsel %vm1135_vm13, %v1800_v58, 0.0  ;;  %vm1293_vm14 = vcmp.gt.f32.partialorder %v2559_v14, 0.0  ;;  %vm1294_vm9 = vcmp.gt.f32.partialorder %v2561_v15, 0.0 }
 0x1f7   : > { %v1973_v6 = vpop.eup %1972  ;;  %v1365_v49 = vmul.f32 0.6931472, %v1971_v37  ;;  %1984 = vlog2.f32 %v1355_v27  ;;  %v2645_v37 = vmul.f32 0.6931472, %v2557_v61  ;;  %vm1295_vm2 = vcmp.gt.f32.partialorder %v2563_v40, 0.0 }
 0x1f8   : > { %v1975_v28 = vpop.eup %1974  ;;  %1986 = vlog2.f32 %v1315_v21  ;;  %v1367_v2 = vmul.f32 0.6931472, %v1973_v6  ;;  %vm1296_vm15 = vcmp.gt.f32.partialorder %v2570_v36, 0.0  ;;  %vm1297_vm0 = vcmp.gt.f32.partialorder %v2572_v20, 0.0 }
 0x1f9   : > { %v1977_v50 = vpop.eup %1976  ;;  %v1369_v19 = vmul.f32 0.6931472, %v1975_v28  ;;  %1988 = vlog2.f32 %v1356_v33  ;;  %v1396_v24 = vsub.f32 %v1317_v52, %v1365_v49  ;;  %v1500_v52 = vsel %vm1135_vm13, %v1801_v18, 0.0 }
 0x1fa   : > { %v1979_v51 = vpop.eup %1978  ;;  %v1371_v38 = vmul.f32 0.6931472, %v1977_v50  ;;  %v1397_v54 = vsub.f32 %v2579_v22, %v1367_v2  ;;  %1990 = vlog2.f32 %v1357_v34  ;;  %v1806_v18 = vsel %vm1290_vm11, 1.0, %v2047_v57 }
 0x1fb   : > { %v1981_v3 = vpop.eup %1980  ;;  %v1373_v4 = vmul.f32 0.6931472, %v1979_v51  ;;  %v1398_v12 = vsub.f32 %v2587_v31, %v1369_v19  ;;  %1992 = vlog2.f32 %v1358_v42  ;;  %v1412_v39 = vsel %vm1284_vm1, %v1396_v24, 0.0 }
 0x1fc   : > { %v1983_v7 = vpop.eup %1982  ;;  %v1375_v9 = vmul.f32 0.6931472, %v1981_v3  ;;  %1994 = vlog2.f32 %v1359_v45  ;;  %v1399_v31 = vsub.f32 %v2589_v32, %v1371_v38  ;;  %v1413_v33 = vsel %vm1285_vm3, %v1397_v54, 0.0 }
 0x1fd   : > { %v1985_v21 = vpop.eup %1984  ;;  %v1377_v27 = vmul.f32 0.6931472, %v1983_v7  ;;  %1996 = vlog2.f32 %v1360_v43  ;;  %v1400_v46 = vsub.f32 %v2591_v60, %v1373_v4  ;;  %v1804_v42 = vsel %vm1288_vm8, 1.0, %v2047_v57 }
 0x1fe   : > { %v2638_v22 = vpop.eup %1986  ;;  %v1379_v6 = vmul.f32 0.6931472, %v1985_v21  ;;  %v1401_v49 = vsub.f32 %v2595_v35, %v1375_v9  ;;  %v1414_v32 = vsel %vm1286_vm6, %v1398_v12, 0.0  ;;  %v1428_v53 = vsel %vm1135_vm13, %v1412_v39, 0.0 }
 0x1ff   : > { %v1989_v34 = vpop.eup %1988  ;;  %1998 = vlog2.f32 %v1361_v47  ;;  %v1429_v61 = vsel %vm1135_vm13, %v1413_v33, 0.0  ;;  %v1805_v60 = vsel %vm1289_vm10, 1.0, %v2047_v57  ;;  %v1501_v43 = vadd.f32 %v1500_v52, %v1499_v26 }
 0x200   : > { %v1991_v45 = vpop.eup %1990  ;;  %v1381_v28 = vmul.f32 0.6931472, %v1989_v34  ;;  %v1402_v2 = vsub.f32 %v2600_v44, %v1377_v27  ;;  %v1415_v56 = vsel %vm1287_vm7, %v1399_v31, 0.0  ;;  %v1430_v35 = vadd.f32 %v1429_v61, %v1428_v53 }
 0x201   : > { %v1993_v50 = vpop.eup %1992  ;;  %2000 = vlog2.f32 %v1362_v41  ;;  %v1416_v47 = vsel %vm1288_vm8, %v1400_v46, 0.0  ;;  %v1431_v19 = vsel %vm1135_vm13, %v1414_v32, 0.0  ;;  %v1502_v24 = vsel %vm1135_vm13, %v1802_v17, 0.0 }
 0x202   : > { %v1995_v51 = vpop.eup %1994  ;;  %v1383_v38 = vmul.f32 0.6931472, %v1991_v45  ;;  %v1403_v54 = vsub.f32 %v2606_v5, %v1379_v6  ;;  %v1417_v48 = vsel %vm1289_vm10, %v1401_v49, 0.0  ;;  %v1432_v44 = vadd.f32 %v1431_v19, %v1430_v35 }
 0x203   : > { %v1997_v58 = vpop.eup %1996  ;;  %v1339_v41 = vmul.f32 0.6931472, %v2568_v23  ;;  %2002 = vlog2.f32 %v1363_v55  ;;  %v1433_v13 = vsel %vm1135_vm13, %v1415_v56, 0.0  ;;  %v1385_v3 = vmul.f32 0.6931472, %v1993_v50 }
 0x204   : > { %v1404_v5 = vsub.f32 %v2619_v59, %v1381_v28  ;;  %v1418_v1 = vsel %vm1290_vm11, %v1402_v2, 0.0  ;;  %v1434_v4 = vadd.f32 %v1433_v13, %v1432_v44  ;;  %v1435_v23 = vsel %vm1135_vm13, %v1416_v47, 0.0 }
 0x205   : > { %v1999_v7 = vpop.eup %1998  ;;  %v1437_v55 = vsel %vm1135_vm13, %v1417_v48, 0.0  ;;  %v1807_v9 = vsel %vm1291_vm12, 1.0, %v2047_v57  ;;  %v1503_v12 = vadd.f32 %v1502_v24, %v1501_v43  ;;  %v1387_v17 = vmul.f32 0.6931472, %v1995_v51 }
 0x206   : > { %v1405_v21 = vsub.f32 %v2622_v0, %v1383_v38  ;;  %v1419_v8 = vsel %vm1291_vm12, %v1403_v54, 0.0  ;;  %v1436_v59 = vadd.f32 %v1435_v23, %v1434_v4  ;;  %v1341_v26 = vmul.f32 0.6931472, %v2575_v16 }
 0x207   : > { %v2001_v39 = vpop.eup %2000  ;;  %v1439_v52 = vsel %vm1135_vm13, %v1418_v1, 0.0  ;;  %v1808_v27 = vsel %vm1292_vm4, 1.0, %v2047_v57  ;;  %v1504_v31 = vsel %vm1135_vm13, %v2632_v62, 0.0  ;;  %v1389_v33 = vmul.f32 0.6931472, %v1997_v58 }
 0x208   : > { %v1406_v34 = vsub.f32 %v2645_v37, %v1385_v3  ;;  %v1420_v10 = vsel %vm1292_vm4, %v1404_v5, 0.0  ;;  %v1438_v0 = vadd.f32 %v1437_v55, %v1436_v59  ;;  %v1343_v6 = vmul.f32 0.6931472, %v2582_v30 }
 0x209   : > { %v2003_v46 = vpop.eup %2002  ;;  %v1391_v16 = vmul.f32 0.6931472, %v1999_v7  ;;  %v1441_v49 = vsel %vm1135_vm13, %v1419_v8, 0.0  ;;  %v1506_v32 = vsel %vm1135_vm13, %v1804_v42, 0.0  ;;  %v1407_v53 = vsub.f32 %v1339_v41, %v1387_v17 }
 0x20a   : > { %v1421_v45 = vsel %vm1293_vm14, %v1405_v21, 0.0  ;;  %v1440_v62 = vadd.f32 %v1439_v52, %v1438_v0  ;;  %v1505_v61 = vadd.f32 %v1504_v31, %v1503_v12  ;;  %v1345_v37 = vmul.f32 0.6931472, %v2593_v63 }
 0x20b   : > { %v1393_v43 = vmul.f32 0.6931472, %v2001_v39  ;;  %v1443_v11 = vsel %vm1135_vm13, %v1420_v10, 0.0  ;;  %v1508_v28 = vsel %vm1135_vm13, %v1805_v60, 0.0  ;;  %v1408_v2 = vsub.f32 %v1341_v26, %v1389_v33 }
 0x20c   : > { %v1422_v30 = vsel %vm1294_vm9, %v1406_v34, 0.0  ;;  %v1442_v56 = vadd.f32 %v1441_v49, %v1440_v62  ;;  %v1507_v35 = vadd.f32 %v1506_v32, %v1505_v61  ;;  %v1347_v42 = vmul.f32 0.6931472, %v2638_v22 }
 0x20d   : > { %v1395_v50 = vmul.f32 0.6931472, %v2003_v46  ;;  %v1445_v47 = vsel %vm1135_vm13, %v1421_v45, 0.0  ;;  %v1510_v19 = vsel %vm1135_vm13, %v1806_v18, 0.0  ;;  %v1409_v24 = vsub.f32 %v1343_v6, %v1391_v16 }
 0x20e   : > { %v1423_v63 = vsel %vm1295_vm2, %v1407_v53, 0.0  ;;  %v1444_v51 = vadd.f32 %v1443_v11, %v1442_v56  ;;  %v1509_v38 = vadd.f32 %v1508_v28, %v1507_v35  ;;  %v1447_v60 = vsel %vm1135_vm13, %v1422_v30, 0.0 }
 0x20f   : > { %v1809_v54 = vsel %vm1293_vm14, 1.0, %v2047_v57  ;;  %v1512_v22 = vsel %vm1135_vm13, %v1807_v9, 0.0  ;;  %v1410_v48 = vsub.f32 %v1345_v37, %v1393_v43  ;;  %v1424_v44 = vsel %vm1296_vm15, %v1408_v2, 0.0 }
 0x210   : > { %v1446_v58 = vadd.f32 %v1445_v47, %v1444_v51  ;;  %v1511_v41 = vadd.f32 %v1510_v19, %v1509_v38  ;;  %vm1298_vm5 = vcmp.gt.f32.partialorder %v2577_v25, 0.0  ;;  %v1449_v13 = vsel %vm1135_vm13, %v1423_v63, 0.0 }
 0x211   : > { %v1810_v18 = vsel %vm1294_vm9, 1.0, %v2047_v57  ;;  %v1514_v3 = vsel %vm1135_vm13, %v1808_v27, 0.0  ;;  %v1411_v14 = vsub.f32 %v1347_v42, %v1395_v50  ;;  %v1425_v5 = vsel %vm1297_vm0, %v1409_v24, 0.0 }
 0x212   : > { %v1448_v1 = vadd.f32 %v1447_v60, %v1446_v58  ;;  %v1513_v4 = vadd.f32 %v1512_v22, %v1511_v41  ;;  %vm1299_vm1 = vcmp.gt.f32.partialorder %v2584_v29, 0.0  ;;  %v1451_v7 = vsel %vm1135_vm13, %v1424_v44, 0.0 }
 0x213   : > { %v1516_v23 = vsel %vm1135_vm13, %v1809_v54, 0.0  ;;  %v1426_v55 = vsel %vm1298_vm5, %v1410_v48, 0.0  ;;  %v1811_v15 = vsel %vm1295_vm2, 1.0, %v2047_v57  ;;  %v1453_v17 = vsel %vm1135_vm13, %v1425_v5, 0.0 }
 0x214   : > { %v1450_v9 = vadd.f32 %v1449_v13, %v1448_v1  ;;  %v1515_v12 = vadd.f32 %v1514_v3, %v1513_v4  ;;  %v1518_v21 = vsel %vm1135_vm13, %v1810_v18, 0.0  ;;  %v1427_v8 = vsel %vm1299_vm1, %v1411_v14, 0.0 }
 0x215   : > { %v1812_v39 = vsel %vm1296_vm15, 1.0, %v2047_v57  ;;  %v1455_v52 = vsel %vm1135_vm13, %v1426_v55, 0.0  ;;  %v1520_v27 = vsel %vm1135_vm13, %v1811_v15, 0.0  ;;  %v1813_v31 = vsel %vm1297_vm0, 1.0, %v2047_v57 }
 0x216   : > { %v1452_v59 = vadd.f32 %v1451_v7, %v1450_v9  ;;  %v1517_v26 = vadd.f32 %v1516_v23, %v1515_v12  ;;  %v1457_v34 = vsel %vm1135_vm13, %v1427_v8, 0.0  ;;  %v1522_v10 = vsel %vm1135_vm13, %v1812_v39, 0.0 }
 0x217   : > { %v1814_v36 = vsel %vm1298_vm5, 1.0, %v2047_v57  ;;  %v1524_v6 = vsel %vm1135_vm13, %v1813_v31, 0.0  ;;  %v1815_v49 = vsel %vm1299_vm1, 1.0, %v2047_v57  ;;  %vm1465_vm3 = vcmask 0  }
 0x218   : > { %v1454_v40 = vadd.f32 %v1453_v17, %v1452_v59  ;;  %v1519_v33 = vadd.f32 %v1518_v21, %v1517_v26  ;;  %v1526_v32 = vsel %vm1135_vm13, %v1814_v36, 0.0  ;;  %v1528_v62 = vsel %vm1135_vm13, %v1815_v49, 0.0 }
 0x21a   : > { %v1456_v0 = vadd.f32 %v1455_v52, %v1454_v40  ;;  %v1521_v46 = vadd.f32 %v1520_v27, %v1519_v33 }
 0x21c   : > { %v1458_v16 = vadd.f32 %v1457_v34, %v1456_v0  ;;  %v1523_v20 = vadd.f32 %v1522_v10, %v1521_v46 }
 0x21e   : > { %v1459_v53 = vrot.slane %v1458_v16, 4  ;;  %v1525_v45 = vadd.f32 %v1524_v6, %v1523_v20 }
 0x220   : > { %v1460_v61 = vadd.f32 %v1459_v53, %v1458_v16  ;;  %v1527_v25 = vadd.f32 %v1526_v32, %v1525_v45 }
 0x222   : > { %v1461_v37 = vrot.slane %v1460_v61, 2  ;;  %v1529_v43 = vadd.f32 %v1528_v62, %v1527_v25 }
 0x224   : > { %v1462_v11 = vadd.f32 %v1461_v37, %v1460_v61  ;;  %v1530_v28 = vrot.slane %v1529_v43, 4 }
 0x226   : > { %v1463_v2 = vrot.slane %v1462_v11, 1  ;;  %v1531_v30 = vadd.f32 %v1530_v28, %v1529_v43 }
 0x228   : > { %v1464_v29 = vadd.f32 %v1463_v2, %v1462_v11  ;;  %v1532_v57 = vrot.slane %v1531_v30, 2 }
 0x22a   : > { %1466 = vst.msk [vmem:[%s478_s0] sm:$0x1] %vm1465_vm3, %v1464_v29  ;;  %v1533_v56 = vadd.f32 %v1532_v57, %v1531_v30 }
 0x22c   : > { %v1534_v35 = vrot.slane %v1533_v56, 1 }
 0x22e   : > { %v1535_v42 = vadd.f32 %v1534_v35, %v1533_v56 }
 0x230   : > { %1536 = vst.msk [vmem:[%s481_s3] sm:$0x1] %vm1465_vm3, %v1535_v42 }
 0x231 PF: > { %s20_s13 = sadd.s32 1, %s2042_s13   ;;  %s2823_s10 = sld [smem:[#allocation4_spill]] }
 0x232   : > { %p17_p11 = scmp.ge.s32.totalorder %s20_s13, 6   ;;  %s2824_s23 = sld [smem:[#allocation5_spill]] }
 0x233   : > { %s2825_s12 = sld [smem:[#allocation6_spill]]  ;;  %s2826_s30 = smov %s2034_s11 }
 0x234   :  { %19 = sbr.rel (!%p17_p11) target bundleno = 5 (0x5), region = 123 }
 0x238   : > { %s2827_s11 = smov %s2824_s23 }

</bundles_post_ra>
